<compile_context>
chip_gen: v7x
topology: tpu7x:2x2x1
jax: 0.10.0
libtpu: 0.0.40
codegen_flags: <defaults>
</compile_context>

<pallas_src>
import functools

import jax
import jax.numpy as jnp
from jax import lax
from jax.experimental import pallas as pl
from jax.experimental.pallas import tpu as pltpu


def _flash_attn_kernel(q_ref, k_ref, v_ref, x_ref, gamma_ref, o_ref,
                       m_scr, l_scr, acc_scr,
                       *, tk, n_valid, has_pad, resident_kv, exp_dtype):
    ki = pl.program_id(2)
    nk = pl.num_programs(2)

    # --- init at the first key tile: zero the online-softmax statistics.
    @pl.when(ki == 0)
    def _init():
        m_scr[...] = jnp.full(m_scr.shape, -jnp.inf, dtype=jnp.float32)
        l_scr[...] = jnp.zeros(l_scr.shape, dtype=jnp.float32)
        acc_scr[...] = jnp.zeros(acc_scr.shape, dtype=jnp.float32)

    # --- current key tile (channel-on-sublane, pixel-on-lane layout).
    if resident_kv:
        # Full-N K/V block is VMEM-resident per batch; slice the key tile.
        kstart = pl.multiple_of(ki * tk, 128)
        k = k_ref[0, :, pl.ds(kstart, tk)]        # (C8, TK) f32
        v = v_ref[0, :, pl.ds(kstart, tk)]        # (C,  TK) f32
    else:
        k = k_ref[0]                              # (C8, TK) f32
        v = v_ref[0]                              # (C,  TK) f32

    q = q_ref[0]                                  # (C8, TQ) f32

    # --- scores s[k, q] = energy[q, k], computed in f32: the contraction dim
    # is only C//8 so the MXU is idle either way and f32 accuracy is free.
    s = lax.dot_general(k, q, (((0,), (0,)), ((), ())),
                        preferred_element_type=jnp.float32)       # (TK, TQ)

    if has_pad:
        # Mask padded key pixels (only the last key tile has any).
        key_idx = lax.broadcasted_iota(jnp.int32, (tk, 1), 0) + ki * tk
        s = jnp.where(key_idx < n_valid, s, float("-inf"))

    # --- online softmax over the key axis (axis 0); stats are (1, TQ).
    m_prev = m_scr[...]
    m_new = jnp.maximum(m_prev, jnp.max(s, axis=0, keepdims=True))
    alpha = jnp.exp(m_prev - m_new)                               # (1, TQ)
    p = jnp.exp((s - m_new).astype(exp_dtype))                    # (TK, TQ)
    l_scr[...] = alpha * l_scr[...] + jnp.sum(p, axis=0, keepdims=True,
                                              dtype=jnp.float32)
    p_mm = p if p.dtype == jnp.bfloat16 else p.astype(jnp.bfloat16)
    acc_scr[...] = alpha * acc_scr[...] + lax.dot_general(
        v.astype(jnp.bfloat16), p_mm, (((1,), (0,)), ((), ())),
        preferred_element_type=jnp.float32)                       # (C, TQ)
    m_scr[...] = m_new

    # --- finalize on the last key tile: normalize, gamma residual, store.
    @pl.when(ki == nk - 1)
    def _finalize():
        out = acc_scr[...] / l_scr[...]           # exact divide, once per q tile
        o_ref[0] = gamma_ref[0, 0] * out + x_ref[0]


def _round_up(x, m):
    return ((x + m - 1) // m) * m


def self_attention_pallas(x_nchw, wq, bq, wk, bk, wv, bv, gamma):
    """x_nchw: (B, C, W, H) f32. wq/wk: (C, C//8), wv: (C, C) stored (in, out).
    Biases: bq/bk (C//8, 1), bv (C, 1). gamma: (1, 1). Returns (B, C, W, H)."""
    B, C, W, H = x_nchw.shape
    N = W * H
    C8 = wq.shape[1]

    # Same memory layout as torch's .view(B, C, W*H): no transpose.
    x_cn = x_nchw.reshape(B, C, N)

    # 1x1 convs == per-pixel linears over channels.  Project once with XLA
    # einsums so the kernel never re-projects K/V per grid step.
    q = jnp.einsum("co,bcn->bon", wq, x_cn) + bq[None]            # (B, C8, N)
    k = jnp.einsum("co,bcn->bon", wk, x_cn) + bk[None]            # (B, C8, N)
    v = jnp.einsum("co,bcn->bon", wv, x_cn) + bv[None]            # (B, C,  N)

    # --- tile selection: 512-wide tiles amortize per-grid-step overhead;
    # shrink for small images; keep >= 2 parallel grid slices for v7x's 2 TCs.
    n128 = _round_up(N, 128)
    TK = 512
    while TK > 128 and TK // 2 >= n128:
        TK //= 2
    TQ = TK
    while TQ > 128 and B * pl.cdiv(N, TQ) < 2:
        TQ //= 2
    N_pad = _round_up(N, max(TQ, TK))
    has_pad = N_pad != N

    if has_pad:
        pad = ((0, 0), (0, 0), (0, N_pad - N))
        q, k, v = jnp.pad(q, pad), jnp.pad(k, pad), jnp.pad(v, pad)
        x_in = jnp.pad(x_cn, pad)
    else:
        x_in = x_cn

    # Projected K/V cost only (C8+C)*4 bytes/pixel: keep the whole key axis
    # VMEM-resident per batch when it fits, so key-side HBM traffic happens
    # once per batch instead of once per query tile.
    resident_kv = 2 * (C8 + C) * N_pad * 4 <= 16 * 1024 * 1024
    if resident_kv:
        k_spec = pl.BlockSpec((1, C8, N_pad), lambda b, qi, ki: (b, 0, 0))
        v_spec = pl.BlockSpec((1, C, N_pad), lambda b, qi, ki: (b, 0, 0))
    else:
        # TODO(synk): pipeline_mode=pl.Buffered(3) would help hide the small
        # key-tile DMAs in this fallback; irrelevant on the resident path.
        k_spec = pl.BlockSpec((1, C8, TK), lambda b, qi, ki: (b, 0, ki))
        v_spec = pl.BlockSpec((1, C, TK), lambda b, qi, ki: (b, 0, ki))

    # bf16 exp halves EUP/VPU work on v6e/v7x; v5e and older have no bf16
    # VPU/EUP, so keep f32 there.
    try:
        kind = jax.devices()[0].device_kind.lower()
    except Exception:  # pragma: no cover - defensive
        kind = ""
    exp_dtype = (jnp.float32
                 if any(g in kind for g in ("v2", "v3", "v4", "v5"))
                 else jnp.bfloat16)

    kernel = functools.partial(
        _flash_attn_kernel, tk=TK, n_valid=N, has_pad=has_pad,
        resident_kv=resident_kv, exp_dtype=exp_dtype)

    grid = (B, N_pad // TQ, N_pad // TK)

    out_cn = pl.pallas_call(
        kernel,
        out_shape=jax.ShapeDtypeStruct((B, C, N_pad), jnp.float32),
        grid=grid,
        in_specs=[
            pl.BlockSpec((1, C8, TQ), lambda b, qi, ki: (b, 0, qi)),  # q tile
            k_spec,                                                   # k
            v_spec,                                                   # v
            pl.BlockSpec((1, C, TQ), lambda b, qi, ki: (b, 0, qi)),   # x (residual)
            pl.BlockSpec(memory_space=pltpu.SMEM),                    # gamma scalar
        ],
        out_specs=pl.BlockSpec((1, C, TQ), lambda b, qi, ki: (b, 0, qi)),
        scratch_shapes=[
            pltpu.VMEM((1, TQ), jnp.float32),    # running max m
            pltpu.VMEM((1, TQ), jnp.float32),    # running denom l
            pltpu.VMEM((C, TQ), jnp.float32),    # output accumulator
        ],
        compiler_params=pltpu.CompilerParams(
            dimension_semantics=("parallel", "parallel", "arbitrary"),
            vmem_limit_bytes=48 * 1024 * 1024),
    )(q, k, v, x_in, gamma)

    if has_pad:
        out_cn = out_cn[:, :, :N]
    return out_cn.reshape(B, C, W, H)


def _reference(x_nchw, wq, bq, wk, bk, wv, bv, gamma):
    """Pure-JAX f32 reference mirroring the PyTorch forward exactly."""
    B, C, W, H = x_nchw.shape
    N = W * H
    xf = x_nchw.reshape(B, C, N)
    q = jnp.einsum("co,bcn->bon", wq, xf) + bq[None]
    k = jnp.einsum("co,bcn->bon", wk, xf) + bk[None]
    v = jnp.einsum("co,bcn->bon", wv, xf) + bv[None]
    energy = jnp.einsum("bcn,bcm->bnm", q, k)
    attn = jax.nn.softmax(energy, axis=-1)
    out = jnp.einsum("bcm,bnm->bcn", v, attn).reshape(B, C, W, H)
    return gamma[0, 0] * out + x_nchw


def _make_params(key, C, C8):
    ks = jax.random.split(key, 7)
    wq = 0.1 * jax.random.normal(ks[0], (C, C8), dtype=jnp.float32)
    bq = 0.1 * jax.random.normal(ks[1], (C8, 1), dtype=jnp.float32)
    wk = 0.1 * jax.random.normal(ks[2], (C, C8), dtype=jnp.float32)
    bk = 0.1 * jax.random.normal(ks[3], (C8, 1), dtype=jnp.float32)
    wv = 0.1 * jax.random.normal(ks[4], (C, C), dtype=jnp.float32)
    bv = 0.1 * jax.random.normal(ks[5], (C, 1), dtype=jnp.float32)
    # PyTorch init is gamma = 0; use a nonzero value so the attention path is
    # actually exercised/verified.
    gamma = jnp.array([[0.5]], dtype=jnp.float32)
    return wq, bq, wk, bk, wv, bv, gamma


if __name__ == "__main__":
    key = jax.random.PRNGKey(0)
    k_params, k_x1, k_x2 = jax.random.split(key, 3)

    # in_dim = 16 (so C//8 = 2), 16x16 spatial -> N = 256 (128-aligned path).
    B, C, W, H = 2, 16, 16, 16
    params = _make_params(k_params, C, C // 8)
    x = jax.random.normal(k_x1, (B, C, W, H), dtype=jnp.float32)

    out = jax.block_until_ready(self_attention_pallas(x, *params))
    ref = _reference(x, *params)
    assert out.shape == (B, C, W, H)
    assert jnp.allclose(out, ref, atol=1e-2, rtol=1e-2), (
        "mismatch vs reference; max abs err = %g"
        % float(jnp.max(jnp.abs(out - ref))))

    # Unaligned spatial size (12x12 -> N = 144): exercises the padded-key /
    # masked-softmax path that replaced the old full-N fallback.
    B2, W2, H2 = 1, 12, 12
    x2 = jax.random.normal(k_x2, (B2, C, W2, H2), dtype=jnp.float32)
    out2 = jax.block_until_ready(self_attention_pallas(x2, *params))
    ref2 = _reference(x2, *params)
    assert out2.shape == (B2, C, W2, H2)
    assert jnp.allclose(out2, ref2, atol=1e-2, rtol=1e-2), (
        "padded-path mismatch vs reference; max abs err = %g"
        % float(jnp.max(jnp.abs(out2 - ref2))))

    print("KERNEL_OK")
</pallas_src>

<mosaic_0001>
module attributes {stable_mosaic.version = 11 : i64} {
  func.func @_flash_attn_kernel(%arg0: i32, %arg1: i32, %arg2: i32, %arg3: memref<1x2x256xf32, #tpu.memory_space<vmem>>, %arg4: memref<1x2x256xf32, #tpu.memory_space<vmem>>, %arg5: memref<1x16x256xf32, #tpu.memory_space<vmem>>, %arg6: memref<1x16x256xf32, #tpu.memory_space<vmem>>, %arg7: memref<1x1xf32, #tpu.memory_space<smem>>, %arg8: memref<1x16x256xf32, #tpu.memory_space<vmem>>, %arg9: memref<1x256xf32, #tpu.memory_space<vmem>>, %arg10: memref<1x256xf32, #tpu.memory_space<vmem>>, %arg11: memref<16x256xf32, #tpu.memory_space<vmem>>) attributes {dimension_semantics = [#tpu.dimension_semantics<parallel>, #tpu.dimension_semantics<parallel>, #tpu.dimension_semantics<arbitrary>], iteration_bounds = array<i64: 2, 1, 1>, scalar_prefetch = 0 : i64, scratch_operands = 3 : i64, tpu.core_type = #tpu.core_type<tc>, window_params = [{transform_indices = @transform_0, window_bounds = array<i64: 1, 2, 256>}, {transform_indices = @transform_1, window_bounds = array<i64: 1, 2, 256>}, {transform_indices = @transform_2, window_bounds = array<i64: 1, 16, 256>}, {transform_indices = @transform_3, window_bounds = array<i64: 1, 16, 256>}, {transform_indices = @transform_4, window_bounds = array<i64: 1, 1>}, {transform_indices = @transform_5, window_bounds = array<i64: 1, 16, 256>}]} {
    %c0_i32 = arith.constant 0 : i32
    %0 = arith.cmpi eq, %arg2, %c0_i32 : i32
    %1 = arith.extui %0 : i1 to i32
    %c0_i32_0 = arith.constant 0 : i32
    %2 = arith.cmpi ne, %1, %c0_i32_0 : i32
    scf.if %2 {
      %cst_24 = arith.constant 0xFF800000 : f32
      %42 = vector.broadcast %cst_24 : f32 to vector<1x256xf32>
      %c0_25 = arith.constant 0 : index
      %c0_26 = arith.constant 0 : index
      %43 = vector.load %arg9[%c0_25, %c0_26] : memref<1x256xf32, #tpu.memory_space<vmem>>, vector<1x256xf32>
      tpu.vector_store %arg9[%c0_25, %c0_26], %42 {strides = array<i32>} : memref<1x256xf32, #tpu.memory_space<vmem>>, vector<1x256xf32>,
      %cst_27 = arith.constant 0.000000e+00 : f32
      %44 = vector.broadcast %cst_27 : f32 to vector<1x256xf32>
      %c0_28 = arith.constant 0 : index
      %c0_29 = arith.constant 0 : index
      %45 = vector.load %arg10[%c0_28, %c0_29] : memref<1x256xf32, #tpu.memory_space<vmem>>, vector<1x256xf32>
      tpu.vector_store %arg10[%c0_28, %c0_29], %44 {strides = array<i32>} : memref<1x256xf32, #tpu.memory_space<vmem>>, vector<1x256xf32>,
      %cst_30 = arith.constant 0.000000e+00 : f32
      %46 = vector.broadcast %cst_30 : f32 to vector<16x256xf32>
      %c0_31 = arith.constant 0 : index
      %c0_32 = arith.constant 0 : index
      %47 = vector.load %arg11[%c0_31, %c0_32] : memref<16x256xf32, #tpu.memory_space<vmem>>, vector<16x256xf32>
      tpu.vector_store %arg11[%c0_31, %c0_32], %46 {strides = array<i32>} : memref<16x256xf32, #tpu.memory_space<vmem>>, vector<16x256xf32>,
    } else {
    }
    %c256_i32 = arith.constant 256 : i32
    %3 = arith.muli %arg2, %c256_i32 : i32
    %4 = tpu.assume_multiple %3, 128 : i32
    %c0 = arith.constant 0 : index
    %c0_1 = arith.constant 0 : index
    %5 = arith.index_cast %4 : i32 to index
    %6 = vector.load %arg4[%c0, %c0_1, %5] : memref<1x2x256xf32, #tpu.memory_space<vmem>>, vector<1x2x256xf32>
    %7 = vector.shape_cast %6 : vector<1x2x256xf32> to vector<2x256xf32>
    %c0_2 = arith.constant 0 : index
    %c0_3 = arith.constant 0 : index
    %8 = arith.index_cast %4 : i32 to index
    %9 = vector.load %arg5[%c0_2, %c0_3, %8] : memref<1x16x256xf32, #tpu.memory_space<vmem>>, vector<1x16x256xf32>
    %10 = vector.shape_cast %9 : vector<1x16x256xf32> to vector<16x256xf32>
    %c0_4 = arith.constant 0 : index
    %c0_5 = arith.constant 0 : index
    %c0_6 = arith.constant 0 : index
    %11 = vector.load %arg3[%c0_4, %c0_5, %c0_6] : memref<1x2x256xf32, #tpu.memory_space<vmem>>, vector<1x2x256xf32>
    %12 = vector.shape_cast %11 : vector<1x2x256xf32> to vector<2x256xf32>
    %cst = arith.constant dense<0.000000e+00> : vector<256x256xf32>
    %13 = tpu.matmul %7, %12, %cst {dimension_numbers = #tpu.dot_dimension_numbers<[0], [0], [1], [1], [0, 1, 1, 1], [], []>} : vector<2x256xf32>, vector<2x256xf32>, vector<256x256xf32> -> vector<256x256xf32>
    %c0_7 = arith.constant 0 : index
    %c0_8 = arith.constant 0 : index
    %14 = vector.load %arg9[%c0_7, %c0_8] : memref<1x256xf32, #tpu.memory_space<vmem>>, vector<1x256xf32>
    %cst_9 = arith.constant dense<0xFF800000> : vector<256xf32>
    %15 = vector.multi_reduction <maximumf>, %13, %cst_9 [0] : vector<256x256xf32> to vector<256xf32>
    %16 = vector.shape_cast %15 : vector<256xf32> to vector<1x256xf32>
    %17 = arith.maximumf %14, %16 : vector<1x256xf32>
    %18 = arith.subf %14, %17 : vector<1x256xf32>
    %19 = math.exp %18 : vector<1x256xf32>
    %20 = vector.broadcast %17 : vector<1x256xf32> to vector<256x256xf32>
    %21 = arith.subf %13, %20 : vector<256x256xf32>
    %22 = arith.truncf %21 : vector<256x256xf32> to vector<256x256xbf16>
    %23 = math.exp %22 : vector<256x256xbf16>
    %c0_10 = arith.constant 0 : index
    %c0_11 = arith.constant 0 : index
    %24 = vector.load %arg10[%c0_10, %c0_11] : memref<1x256xf32, #tpu.memory_space<vmem>>, vector<1x256xf32>
    %25 = arith.mulf %19, %24 : vector<1x256xf32>
    %26 = arith.extf %23 : vector<256x256xbf16> to vector<256x256xf32>
    %cst_12 = arith.constant dense<0.000000e+00> : vector<256xf32>
    %27 = vector.multi_reduction <add>, %26, %cst_12 [0] : vector<256x256xf32> to vector<256xf32>
    %28 = vector.shape_cast %27 : vector<256xf32> to vector<1x256xf32>
    %29 = arith.addf %25, %28 : vector<1x256xf32>
    %c0_13 = arith.constant 0 : index
    %c0_14 = arith.constant 0 : index
    %30 = vector.load %arg10[%c0_13, %c0_14] : memref<1x256xf32, #tpu.memory_space<vmem>>, vector<1x256xf32>
    tpu.vector_store %arg10[%c0_13, %c0_14], %29 {strides = array<i32>} : memref<1x256xf32, #tpu.memory_space<vmem>>, vector<1x256xf32>,
    %c0_15 = arith.constant 0 : index
    %c0_16 = arith.constant 0 : index
    %31 = vector.load %arg11[%c0_15, %c0_16] : memref<16x256xf32, #tpu.memory_space<vmem>>, vector<16x256xf32>
    %32 = vector.broadcast %19 : vector<1x256xf32> to vector<16x256xf32>
    %33 = arith.mulf %32, %31 : vector<16x256xf32>
    %34 = arith.truncf %10 : vector<16x256xf32> to vector<16x256xbf16>
    %cst_17 = arith.constant dense<0.000000e+00> : vector<16x256xf32>
    %35 = tpu.matmul %34, %23, %cst_17 {dimension_numbers = #tpu.dot_dimension_numbers<[1], [0], [0], [1], [0, 0, 1, 1], [], []>} : vector<16x256xbf16>, vector<256x256xbf16>, vector<16x256xf32> -> vector<16x256xf32>
    %36 = arith.addf %33, %35 : vector<16x256xf32>
    %c0_18 = arith.constant 0 : index
    %c0_19 = arith.constant 0 : index
    %37 = vector.load %arg11[%c0_18, %c0_19] : memref<16x256xf32, #tpu.memory_space<vmem>>, vector<16x256xf32>
    tpu.vector_store %arg11[%c0_18, %c0_19], %36 {strides = array<i32>} : memref<16x256xf32, #tpu.memory_space<vmem>>, vector<16x256xf32>,
    %c0_20 = arith.constant 0 : index
    %c0_21 = arith.constant 0 : index
    %38 = vector.load %arg9[%c0_20, %c0_21] : memref<1x256xf32, #tpu.memory_space<vmem>>, vector<1x256xf32>
    tpu.vector_store %arg9[%c0_20, %c0_21], %17 {strides = array<i32>} : memref<1x256xf32, #tpu.memory_space<vmem>>, vector<1x256xf32>,
    %c0_i32_22 = arith.constant 0 : i32
    %39 = arith.cmpi eq, %arg2, %c0_i32_22 : i32
    %40 = arith.extui %39 : i1 to i32
    %c0_i32_23 = arith.constant 0 : i32
    %41 = arith.cmpi ne, %40, %c0_i32_23 : i32
    scf.if %41 {
      %c0_24 = arith.constant 0 : index
      %c0_25 = arith.constant 0 : index
      %42 = vector.load %arg11[%c0_24, %c0_25] : memref<16x256xf32, #tpu.memory_space<vmem>>, vector<16x256xf32>
      %c0_26 = arith.constant 0 : index
      %c0_27 = arith.constant 0 : index
      %43 = vector.load %arg10[%c0_26, %c0_27] : memref<1x256xf32, #tpu.memory_space<vmem>>, vector<1x256xf32>
      %44 = vector.broadcast %43 : vector<1x256xf32> to vector<16x256xf32>
      %45 = arith.divf %42, %44 : vector<16x256xf32>
      %c0_28 = arith.constant 0 : index
      %c0_29 = arith.constant 0 : index
      %46 = memref.load %arg7[%c0_28, %c0_29] : memref<1x1xf32, #tpu.memory_space<smem>>
      %47 = vector.broadcast %46 : f32 to vector<16x256xf32>
      %48 = arith.mulf %47, %45 : vector<16x256xf32>
      %c0_30 = arith.constant 0 : index
      %c0_31 = arith.constant 0 : index
      %c0_32 = arith.constant 0 : index
      %49 = vector.load %arg6[%c0_30, %c0_31, %c0_32] : memref<1x16x256xf32, #tpu.memory_space<vmem>>, vector<1x16x256xf32>
      %50 = vector.shape_cast %49 : vector<1x16x256xf32> to vector<16x256xf32>
      %51 = arith.addf %48, %50 : vector<16x256xf32>
      %c0_33 = arith.constant 0 : index
      %c0_34 = arith.constant 0 : index
      %c0_35 = arith.constant 0 : index
      %52 = vector.load %arg8[%c0_33, %c0_34, %c0_35] : memref<1x16x256xf32, #tpu.memory_space<vmem>>, vector<1x16x256xf32>
      %53 = vector.shape_cast %52 : vector<1x16x256xf32> to vector<16x256xf32>
      %54 = vector.shape_cast %51 : vector<16x256xf32> to vector<1x16x256xf32>
      tpu.vector_store %arg8[%c0_33, %c0_34, %c0_35], %54 {strides = array<i32>} : memref<1x16x256xf32, #tpu.memory_space<vmem>>, vector<1x16x256xf32>,
    } else {
    }
    return
  }
  func.func @transform_0(%arg0: i32, %arg1: i32, %arg2: i32) -> (i32, i32, i32) {
    %c0_i32 = arith.constant 0 : i32
    %c0_i32_0 = arith.constant 0 : i32
    return %arg0, %c0_i32, %arg1 : i32, i32, i32
  }
  func.func @transform_1(%arg0: i32, %arg1: i32, %arg2: i32) -> (i32, i32, i32) {
    %c0_i32 = arith.constant 0 : i32
    %c0_i32_0 = arith.constant 0 : i32
    %c0_i32_1 = arith.constant 0 : i32
    return %arg0, %c0_i32, %c0_i32_0 : i32, i32, i32
  }
  func.func @transform_2(%arg0: i32, %arg1: i32, %arg2: i32) -> (i32, i32, i32) {
    %c0_i32 = arith.constant 0 : i32
    %c0_i32_0 = arith.constant 0 : i32
    %c0_i32_1 = arith.constant 0 : i32
    return %arg0, %c0_i32, %c0_i32_0 : i32, i32, i32
  }
  func.func @transform_3(%arg0: i32, %arg1: i32, %arg2: i32) -> (i32, i32, i32) {
    %c0_i32 = arith.constant 0 : i32
    %c0_i32_0 = arith.constant 0 : i32
    return %arg0, %c0_i32, %arg1 : i32, i32, i32
  }
  func.func @transform_4(%arg0: i32, %arg1: i32, %arg2: i32) -> (i32, i32) {
    %c0_i32 = arith.constant 0 : i32
    %c0_i32_0 = arith.constant 0 : i32
    %c0_i32_1 = arith.constant 0 : i32
    return %c0_i32, %c0_i32_0 : i32, i32
  }
  func.func @transform_5(%arg0: i32, %arg1: i32, %arg2: i32) -> (i32, i32, i32) {
    %c0_i32 = arith.constant 0 : i32
    %c0_i32_0 = arith.constant 0 : i32
    return %arg0, %c0_i32, %arg1 : i32, i32, i32
  }
}

</mosaic_0001>

<bundles_post_ra>
// kernel: tpu_custom_call.1
= control target key start
LH: loop header
LB: loop body
LE: loop exit
PB: predicated region body
PF: predicated region fallthrough
CT: control target
= control target key end

     0   :  { %s2928_s0 = inlined_call_operand.hbm [shape: f32[2,2,256], index: 0, kind: input, shape index: {}]   ;;  %s2929_s1 = inlined_call_operand.hbm [shape: f32[2,2,256], index: 1, kind: input, shape index: {}]   ;;  %s2930_s2 = inlined_call_operand.hbm [shape: f32[2,16,256], index: 2, kind: input, shape index: {}]   ;;  %s2931_s3 = inlined_call_operand.hbm [shape: f32[2,16,256], index: 3, kind: input, shape index: {}]   ;;  %s2932_s4 = inlined_call_operand.<no memory space> [shape: f32[1,1], index: 4, kind: input, shape index: {}]   ;;  %s2933_s5 = inlined_call_operand.hbm [shape: f32[2,16,256], index: 5, kind: output, shape index: {}]  }
   0x1   :  { %2978 = sst [smem:[#allocation56_spill]] %s2929_s1 }
   0x2   :  { %10 = sst [smem:[#allocation5]] %s2932_s4 }
   0x3   :  { %11 = vsyncpa [#allocation7], 0 }
   0x4   :  { %13 = vsyncpa [#allocation7 + $0x1], 0 }
   0x5   :  { %14 = vsyncpa [#allocation10], 0 }
   0x6   :  { %16 = vsyncpa [#allocation10 + $0x1], 0 }
   0x7   :  { %17 = vsyncpa [#allocation13], 0 }
   0x8   :  { %19 = vsyncpa [#allocation13 + $0x1], 0 }
   0x9   :  { %20 = vsyncpa [#allocation8], 0 }
   0xa   :  { %22 = vsyncpa [#allocation8 + $0x1], 0  ;;  %s2097_s20 = smov 0   ;;  %s2099_s21 = smov 0  }
   0xb   :  { %s2101_s22 = smov 0   ;;  %s2103_s23 = smov 0  }
   0xc   :  { %s2105_s24 = smov 0   ;;  %s2107_s25 = smov 0  }
   0xd LB: > { %2979 = sst [smem:[#allocation19_spill]] %s2038_s22  ;;  %s2128_s4 = sadd.s32 4294967295, %s2050_s25   ;;  %s2050_s25 = sphi %s2107_s25, %s28_s25   ;;  %s2046_s24 = sphi %s2105_s24, %s3081_s24   ;;  %s2042_s23 = sphi %s2103_s23, %s3080_s23   ;;  %s2038_s22 = sphi %s2101_s22, %s3076_s22   ;;  %s2034_s21 = sphi %s2099_s21, %s3079_s21   ;;  %s2030_s20 = sphi %s2097_s20, %s3078_s20  }
   0xe   : > { %s1619_s26 = sadd.s32 4294967294, %s2050_s25   ;;  %s47_s27 = sadd.s32 1, %s2046_s24 }
   0xf   : > { %s56_s28 = sadd.s32 1, %s2038_s22  ;;  %p49_p0 = scmp.ge.s32.totalorder %s47_s27, 2 }
  0x10   : > { %p63_p1 = scmp.ne.s32.totalorder %s2038_s22, %s2034_s21  ;;  %p64_p2 = scmp.eq.s32.totalorder %s2050_s25, 0 }
  0x11   : > { %p69_p3 = scmp.ne.s32.totalorder %s2034_s21, %s2030_s20  ;;  %s3083_s27 = smov (%p49_p0, %s47_s27), 0 }
  0x12   : > { %2980 = sst [smem:[#allocation20_spill]] %s3083_s27  ;;  %p2140_p4 = por %p64_p2, %p63_p1 }
  0x13   : > { %p70_p5 = scmp.eq.s32.totalorder %s2128_s4, 0  ;;  %s51_s30 = ssub.s32 %s2046_s24, %s3083_s27 }
  0x14   : > { %p196_p6 = scmp.eq.s32.totalorder %s2128_s4, 1  ;;  %p54_p7 = scmp.eq.s32.totalorder %s51_s30, 0 }
  0x15   : > { %p2148_p8 = por %p70_p5, %p69_p3  ;;  %p202_p10 = scmp.eq.s32.totalorder %s1619_s26, 1 }
  0x16   : > { %p2152_p9 = por %p196_p6, %p63_p1  ;;  %p1713_p13 = scmp.lt.s32.totalorder %s2050_s25, 2 }
  0x17   : > { %s2982_s6 = scalar_select %p2148_p8, 1, 0 }
  0x18   : > { %s2983_s7 = scalar_select %p2152_p9, 1, 0 }
  0x19   : > { %s2157_s8 = scalar_select %p54_p7, %s2038_s22, %s56_s28  }
  0x1a   : > { %p2159_p11 = por %p202_p10, %p69_p3  ;;  %s2166_s10 = sand.u32 1, %s2038_s22  }
  0x1b   : > { %2984 = sst [smem:[#allocation21_spill]] %s2157_s8  ;;  %s2934_s11 = sshll.u32 %s2166_s10, 2 }
  0x1c   : > { %s2985_s9 = scalar_select %p2159_p11, 1, 0 }
  0x1d   : > { %s2935_s12 = sshll.u32 %s2046_s24, 6  ;;  %p2172_p0 = pnand %p1713_p13, %p2140_p4 }
  0x1e   : > { %s246_s14 = sand.u32 1, %s2050_s25   ;;  %s2987_s1 = sld [smem:[#allocation56_spill]] }
  0x1f   : > { %s250_s18 = scalar_lea.vmem [#allocation9], %s2934_s11  ;;  %s2190_s29 = scalar_lea.sflag [#allocation10], %s246_s14 }
  0x20   : > { %s258_s19 = sshll.u32 %s250_s18, 4  ;;  %p2196_p2 = pneg %p2172_p0  ;;  %s2187_s19 = int_to_ptr.vmem [resolvable:$true] %s258_s19 }
  0x24   : > { %s2182_s17 = scalar_lea.hbm %s2987_s1, %s2935_s12  ;;  %s1845_s18 = scalar_lea.hbm %s2987_s1, 128 }
  0x25   : > { %s1840_s30 = scalar_lea.hbm %s2182_s17, 64  ;;  %p1846_p5 = scmp.lt.u32.totalorder %s2182_s17, %s2987_s1 }
  0x26   : > { %p1841_p1 = scmp.ne.s32.totalorder %s2182_s17, %s1840_s30  ;;  %p1847_p6 = scmp.lt.u32.totalorder %s1845_s18, %s1840_s30 }
  0x27   : > { %p1849_p10 = scmp.lt.u32.totalorder %s1840_s30, %s2182_s17 }
  0x28   : > { %p1843_p3 = pnand %p2196_p2, %p1841_p1  ;;  %p1848_p7 = por %p1847_p6, %p1846_p5 }
  0x2a   : > { %p1844_p4 = pneg %p1843_p3  ;;  %p1850_p13 = por %p1849_p10, %p1848_p7 }
  0x2c   : > { %p1851_p12 = pnand %p1850_p13, %p1844_p4 }
  0x2e   : > { %1854 = shalt.err (!%p1851_p12)
}
  0x2f   : > { %s1855_s14 = scalar_lea.vmem %s2187_s19, 64  ;;  %s2052_s11 = smov [#allocation9]  }
  0x30   : > { %p1856_p1 = scmp.ne.s32.totalorder %s2187_s19, %s1855_s14  ;;  %s1860_s16 = sshll.u32 %s2052_s11, 4  ;;  %s1861_s16 = int_to_ptr.vmem [resolvable:$false] %s1860_s16 }
  0x31   : > { %s1862_s12 = scalar_lea.vmem %s1861_s16, 128  ;;  %p1863_p9 = scmp.lt.s32.totalorder %s2187_s19, %s1861_s16 }
  0x32   : > { %p1858_p3 = pnand %p1856_p1, %p2196_p2  ;;  %p1864_p8 = scmp.lt.s32.totalorder %s1862_s12, %s1855_s14 }
  0x34   : > { %p1859_p11 = pneg %p1858_p3  ;;  %p1865_p5 = por %p1864_p8, %p1863_p9 }
  0x36   : > { %p1866_p6 = pnand %p1865_p5, %p1859_p11 }
  0x38   : > { %1869 = shalt.err (!%p1866_p6)
}
  0x39   : > { %1702 = dma.hbm_to_vmem [thread:$0]  (!%p2172_p0), %s2182_s17, 64, %s2187_s19, %s2190_s29  }
  0x3a   : > { %p1634_p12 = scmp.ge.s32.totalorder %s2050_s25, 1  ;;  %p307_p4 = scmp.lt.s32.totalorder %s2050_s25, 3 }
  0x3b   : > { %s2990_s30 = sshll.u32 %s2046_s24, 6  ;;  %s2991_s16 = sshll.u32 %s2166_s10, 2 }
  0x3c   : > { %p2222_p7 = pnand %p1634_p12, %p307_p4  ;;  %s2231_s11 = scalar_lea.hbm %s2928_s0, %s2990_s30 }
  0x3d   : > { %s229_s12 = scalar_lea.vmem [#allocation6], %s2991_s16  ;;  %s2992_s17 = sshll.u32 %s2046_s24, 9 }
  0x3e   : > { %s2989_s26 = scalar_select %p2222_p7, 1, 0 }
  0x3f   : > { %s239_s28 = sshll.u32 %s229_s12, 4  ;;  %s2242_s27 = scalar_lea.hbm %s2930_s2, %s2992_s17  ;;  %s2235_s28 = int_to_ptr.vmem [resolvable:$true] %s239_s28 }
  0x40   : > { %s226_s8 = scalar_lea.sflag [#allocation7], %s2166_s10  ;;  %s1870_s22 = scalar_lea.hbm %s2231_s11, 64 }
  0x41   : > { %p1871_p8 = scmp.ne.s32.totalorder %s2231_s11, %s1870_s22  ;;  %s1875_s14 = scalar_lea.hbm %s2928_s0, 128 }
  0x42   : > { %p1876_p10 = scmp.lt.u32.totalorder %s2231_s11, %s2928_s0  ;;  %p1877_p13 = scmp.lt.u32.totalorder %s1875_s14, %s1870_s22 }
  0x43   : > { %p1873_p9 = pnand %p1871_p8, %p2196_p2  ;;  %p1879_p3 = scmp.lt.u32.totalorder %s1870_s22, %s2231_s11 }
  0x44   : > { %p1878_p1 = por %p1877_p13, %p1876_p10 }
  0x45   : > { %p1874_p11 = pneg %p1873_p9 }
  0x46   : > { %p1880_p5 = por %p1879_p3, %p1878_p1 }
  0x48   : > { %p1881_p6 = pnand %p1880_p5, %p1874_p11 }
  0x4a   : > { %1884 = shalt.err (!%p1881_p6)
}
  0x4b   : > { %s1885_s1 = scalar_lea.vmem %s2235_s28, 64  ;;  %s2053_s17 = smov [#allocation6]  }
  0x4c   : > { %p1886_p12 = scmp.ne.s32.totalorder %s2235_s28, %s1885_s1  ;;  %s1890_s19 = sshll.u32 %s2053_s17, 4  ;;  %s1891_s19 = int_to_ptr.vmem [resolvable:$false] %s1890_s19 }
  0x4d   : > { %s1892_s30 = scalar_lea.vmem %s1891_s19, 128  ;;  %p1893_p9 = scmp.lt.s32.totalorder %s2235_s28, %s1891_s19 }
  0x4e   : > { %p1888_p4 = pnand %p1886_p12, %p2196_p2  ;;  %p1894_p7 = scmp.lt.s32.totalorder %s1892_s30, %s1885_s1 }
  0x50   : > { %p1889_p8 = pneg %p1888_p4  ;;  %p1895_p10 = por %p1894_p7, %p1893_p9 }
  0x52   : > { %p1896_p13 = pnand %p1895_p10, %p1889_p8 }
  0x54   : > { %1899 = shalt.err (!%p1896_p13)
}
  0x55   : > { %1699 = dma.hbm_to_vmem [thread:$0]  (!%p2172_p0), %s2231_s11, 64, %s2235_s28, %s226_s8  }
  0x56   : > { %s2993_s22 = sshll.u32 %s2166_s10, 5  ;;  %s1900_s16 = scalar_lea.hbm %s2242_s27, 512 }
  0x57   : > { %s269_s18 = scalar_lea.vmem [#allocation11], %s2993_s22  ;;  %p1901_p7 = scmp.ne.s32.totalorder %s2242_s27, %s1900_s16 }
  0x58   : > { %s276_s14 = sshll.u32 %s269_s18, 4  ;;  %s1905_s17 = scalar_lea.hbm %s2930_s2, 1024  ;;  %s2268_s14 = int_to_ptr.vmem [resolvable:$true] %s276_s14 }
  0x59   : > { %p1903_p11 = pnand %p1901_p7, %p2196_p2  ;;  %p1906_p3 = scmp.lt.u32.totalorder %s2242_s27, %s2930_s2 }
  0x5a   : > { %p1907_p5 = scmp.lt.u32.totalorder %s1905_s17, %s1900_s16  ;;  %p1909_p12 = scmp.lt.u32.totalorder %s1900_s16, %s2242_s27 }
  0x5b   : > { %p1904_p1 = pneg %p1903_p11 }
  0x5c   : > { %p1908_p6 = por %p1907_p5, %p1906_p3 }
  0x5e   : > { %p1910_p4 = por %p1909_p12, %p1908_p6 }
  0x60   : > { %p1911_p8 = pnand %p1910_p4, %p1904_p1 }
  0x62   : > { %1914 = shalt.err (!%p1911_p8)
}
  0x63   : > { %s1915_s8 = scalar_lea.vmem %s2268_s14, 512  ;;  %s2054_s28 = smov [#allocation11]  }
  0x64   : > { %p1916_p9 = scmp.ne.s32.totalorder %s2268_s14, %s1915_s8  ;;  %s1920_s11 = sshll.u32 %s2054_s28, 4  ;;  %s1921_s11 = int_to_ptr.vmem [resolvable:$false] %s1920_s11 }
  0x65   : > { %s1922_s22 = scalar_lea.vmem %s1921_s11, 1024  ;;  %p1923_p7 = scmp.lt.s32.totalorder %s2268_s14, %s1921_s11 }
  0x66   : > { %p1918_p10 = pnand %p1916_p9, %p2196_p2  ;;  %p1924_p11 = scmp.lt.s32.totalorder %s1922_s22, %s1915_s8 }
  0x68   : > { %p1919_p13 = pneg %p1918_p10  ;;  %p1925_p3 = por %p1924_p11, %p1923_p7 }
  0x6a   : > { %p1926_p5 = pnand %p1925_p3, %p1919_p13 }
  0x6c   : > { %1929 = shalt.err (!%p1926_p5)
}
  0x6d   : > { %s2055_s18 = smov 256   ;;  %s2056_s16 = smov 16  }
  0x6e   : > { %1705 = dma.hbm_to_vmem [thread:$0]  (!%p2172_p0), %s2242_s27, 512, %s2268_s14, %s2190_s29, %s2055_s18, %s2055_s18, %s2056_s16  }
  0x6f   : > { %s2994_s12 = sshll.u32 %s2046_s24, 9  ;;  %s2995_s30 = sshll.u32 %s2166_s10, 5 }
  0x70   : > { %s2300_s19 = scalar_lea.hbm %s2931_s3, %s2994_s12  ;;  %s290_s8 = scalar_lea.vmem [#allocation12], %s2995_s30 }
  0x71   : > { %s299_s28 = sshll.u32 %s290_s8, 4  ;;  %s287_s11 = scalar_lea.sflag [#allocation13], %s2166_s10  ;;  %s2304_s28 = int_to_ptr.vmem [resolvable:$true] %s299_s28 }
  0x72   : > { %s1930_s22 = scalar_lea.hbm %s2300_s19, 512  ;;  %s1935_s14 = scalar_lea.hbm %s2931_s3, 1024 }
  0x73   : > { %p1931_p1 = scmp.ne.s32.totalorder %s2300_s19, %s1930_s22  ;;  %p1936_p4 = scmp.lt.u32.totalorder %s2300_s19, %s2931_s3 }
  0x74   : > { %p1937_p8 = scmp.lt.u32.totalorder %s1935_s14, %s1930_s22  ;;  %p1939_p10 = scmp.lt.u32.totalorder %s1930_s22, %s2300_s19 }
  0x75   : > { %p1933_p6 = pnand %p1931_p1, %p2196_p2 }
  0x76   : > { %p1938_p9 = por %p1937_p8, %p1936_p4 }
  0x77   : > { %p1934_p12 = pneg %p1933_p6 }
  0x78   : > { %p1940_p13 = por %p1939_p10, %p1938_p9 }
  0x7a   : > { %p1941_p7 = pnand %p1940_p13, %p1934_p12 }
  0x7c   : > { %1944 = shalt.err (!%p1941_p7)
}
  0x7d   : > { %s1945_s17 = scalar_lea.vmem %s2304_s28, 512  ;;  %s2057_s30 = smov [#allocation12]  }
  0x7e   : > { %p1946_p11 = scmp.ne.s32.totalorder %s2304_s28, %s1945_s17  ;;  %s1950_s8 = sshll.u32 %s2057_s30, 4  ;;  %s1951_s8 = int_to_ptr.vmem [resolvable:$false] %s1950_s8 }
  0x7f   : > { %s1952_s27 = scalar_lea.vmem %s1951_s8, 1024  ;;  %p1953_p1 = scmp.lt.s32.totalorder %s2304_s28, %s1951_s8 }
  0x80   : > { %p1948_p3 = pnand %p1946_p11, %p2196_p2  ;;  %p1954_p6 = scmp.lt.s32.totalorder %s1952_s27, %s1945_s17 }
  0x82   : > { %p1949_p5 = pneg %p1948_p3  ;;  %p1955_p4 = por %p1954_p6, %p1953_p1 }
  0x84   : > { %p1956_p8 = pnand %p1955_p4, %p1949_p5 }
  0x86   : > { %1959 = shalt.err (!%p1956_p8)
}
  0x87   : > { %1708 = dma.hbm_to_vmem [thread:$0]  (!%p2172_p0), %s2300_s19, 512, %s2304_s28, %s287_s11, %s2055_s18, %s2055_s18, %s2056_s16  }
  0x88   : > { %p2996_p2 = scmp.ne.s32.totalorder %s2989_s26, 0 }
  0x8a   : > { %311 = sbr.rel (%p2996_p2) target bundleno = 997 (0x3e5), region = 40 }
  0x91   : > { %s2336_s15 = sand.u32 1, %s2034_s21   ;;  %p2997_p12 = scmp.ne.s32.totalorder %s2982_s6, 0 }
  0x92   : > { %s1635_s22 = sshll.u32 %s2336_s15, 2  ;;  %s314_s29 = scalar_lea.sflag [#allocation7], %s2336_s15 }
  0x93   : > { %s317_s13 = scalar_lea.vmem [#allocation6], %s1635_s22 }
  0x94   : > { %2013 = dma.done.wait (%p2997_p12), %s314_s29, 64  }
  0x95   : > { %2015 = vsyncadd (%p2997_p12), %s314_s29, 4294967232  ;;  %s322_s10 = sand.u32 1, %s2128_s4   ;;  %s326_s26 = scalar_lea.vmem [#allocation9], %s1635_s22 }
  0x96   : > { %s323_s18 = scalar_lea.sflag [#allocation10], %s322_s10 }
  0x97   : > { %2017 = dma.done.wait (%p2997_p12), %s323_s18, 576  }
  0x98   : > { %2019 = vsyncadd (%p2997_p12), %s323_s18, 4294966720  ;;  %s2350_s16 = sshll.u32 %s2336_s15, 5  ;;  %s341_s28 = scalar_lea.sflag [#allocation13], %s2336_s15 }
  0x99   : > { %s2353_s19 = scalar_lea.vmem [#allocation11], %s2350_s16  ;;  %s2357_s11 = scalar_lea.vmem [#allocation12], %s2350_s16 }
  0x9a   : > { %2021 = dma.done.wait (%p2997_p12), %s341_s28, 512  }
  0x9b   : > { %2023 = vsyncadd (%p2997_p12), %s341_s28, 4294966784  ;;  %v2058_v0 = vmov 0.0   ;;  %v1640_v1 = vld.sshfl [vmem:[%s326_s26] sm:$0x33 pattern:$0x76325410]  ;;  %v2940_v44 = vlaneseq }
  0x9c   : > { %666 = vmatprep.mubr.f32.mxu0 %v2058_v0  ;;  %427 = vxpose.xlu0.b32.start.end [1/1] (short) %v1640_v1, 128  ;;  %v1641_v2 = vld.sshfl [vmem:[%s317_s13] sm:$0x33 pattern:$0x76325410]  ;;  %vm597_vm0 = vcmask 1041408   ;;  %v424_v4 = vcombine.high %v1640_v1, %v1640_v1  ;;  %vm500_vm1 = vcmask 15360  }
  0x9d   : > { %v499_v3 = vcombine.high %v1641_v2, %v1641_v2  ;;  %vm2444_vm2 = vcmp.lt.s32.totalorder %v2940_v44, 256  ;;  %v3000_v46 = vmov 0  ;;  %v2059_v48 = vmov -inf   ;;  %s1421_s4 = sld [smem:[#allocation5]]  ;;  %s385_s6 = scalar_lea.vmem [#allocation14], %s2350_s16 }
  0x9e   : > { %v3001_v46 = vsel %vm2444_vm2, 4294967295, %v3000_v46  ;;  %397 = vst.msk [vmem:[#allocation2] sm:$0x3] %vm2444_vm2, %v2059_v48  ;;  %398 = vst.msk [vmem:[#allocation3] sm:$0x3] %vm2444_vm2, %v2058_v0  ;;  %s1455_s14 = sshll.u32 %s385_s6, 4  ;;  %s2874_s14 = int_to_ptr.vmem [resolvable:$true] %s1455_s14 }
  0x9f   : > { %1642 = vmatprep.subr.msk.mxu0 %vm597_vm0, %v499_v3  ;;  %3002 = vst [vmem:[#allocation24_spill] sm:$0xff] %v3001_v46  ;;  %s1685_s12 = sshll.u32 %s2042_s23, 9  ;;  %s1440_s23 = scalar_lea.sflag [#allocation8], %s2336_s15 }
  0xa0   : > { %1643 = vmatpush1.msk.msra.mxu0 %vm597_vm0, %v1641_v2  ;;  %s2879_s30 = scalar_lea.hbm %s2933_s5, %s1685_s12  ;;  %s1960_s8 = scalar_lea.vmem %s2874_s14, 512 }
  0xa1   : > { %p1961_p0 = scmp.ne.s32.totalorder %s2874_s14, %s1960_s8  ;;  %p3072_p9 = scmp.ne.s32.totalorder %s2983_s7, 0 }
  0xa2   : > { %s2061_s27 = smov [#allocation14]  }
  0xa3   : > { %p1962_p10 = pnand %p1961_p0, %p3072_p9  ;;  %s1964_s22 = sshll.u32 %s2061_s27, 4  ;;  %s1965_s22 = int_to_ptr.vmem [resolvable:$false] %s1964_s22 }
  0xa4   : > { %s1966_s29 = scalar_lea.vmem %s1965_s22, 1024  ;;  %p1967_p7 = scmp.lt.s32.totalorder %s2874_s14, %s1965_s22 }
  0xa5   : > { %p1963_p13 = pneg %p1962_p10  ;;  %p1968_p11 = scmp.lt.s32.totalorder %s1966_s29, %s1960_s8 }
  0xa7   : > { %p1969_p3 = por %p1968_p11, %p1967_p7 }
  0xa9   : > { %p1970_p5 = pnand %p1969_p3, %p1963_p13 }
  0xd9   : > { %459 = vxpose.xlu0.b32.start.end [1/1] (short) %v424_v4, 128 }
 0x11c   : > { %v443_v5 = vpop.trf.xlu0 }
 0x11d   : > { %1644 = vmatmul.mubr.msk.f32.vlgmr.msra.gmra.mrb[0].mxu0 %vm500_vm1, %v443_v5 }
 0x11e   : > { %672 = vmatprep.mubr.f32.mxu0 %v2058_v0 }
 0x120   : > { %v444_v6 = vpop.trf.xlu0 }
 0x121   : > { %1645 = vmatmul.mubr.msk.f32.gmra.mrb[2].mxu0 %vm500_vm1, %v444_v6 }
 0x122   : > { %678 = vmatprep.mubr.f32.mxu0 %v2058_v0 }
 0x124   : > { %v445_v7 = vpop.trf.xlu0 }
 0x125   : > { %1646 = vmatmul.mubr.msk.f32.gmra.mrb[4].mxu0 %vm500_vm1, %v445_v7 }
 0x126   : > { %684 = vmatprep.mubr.f32.mxu0 %v2058_v0 }
 0x128   : > { %v446_v8 = vpop.trf.xlu0 }
 0x129   : > { %1647 = vmatmul.mubr.msk.f32.gmra.mrb[6].mxu0 %vm500_vm1, %v446_v8 }
 0x12a   : > { %690 = vmatprep.mubr.f32.mxu0 %v2058_v0 }
 0x12c   : > { %v447_v9 = vpop.trf.xlu0 }
 0x12d   : > { %1648 = vmatmul.mubr.msk.f32.gmra.mrb[8].mxu0 %vm500_vm1, %v447_v9 }
 0x12e   : > { %696 = vmatprep.mubr.f32.mxu0 %v2058_v0 }
 0x130   : > { %v448_v10 = vpop.trf.xlu0 }
 0x131   : > { %1649 = vmatmul.mubr.msk.f32.gmra.mrb[10].mxu0 %vm500_vm1, %v448_v10 }
 0x132   : > { %702 = vmatprep.mubr.f32.mxu0 %v2058_v0 }
 0x134   : > { %v449_v11 = vpop.trf.xlu0 }
 0x135   : > { %1650 = vmatmul.mubr.msk.f32.gmra.mrb[12].mxu0 %vm500_vm1, %v449_v11 }
 0x136   : > { %708 = vmatprep.mubr.f32.mxu0 %v2058_v0 }
 0x138   : > { %v450_v12 = vpop.trf.xlu0 }
 0x139   : > { %1651 = vmatmul.mubr.msk.f32.gmra.mrb[14].mxu0 %vm500_vm1, %v450_v12 }
 0x13a   : > { %714 = vmatprep.mubr.f32.mxu0 %v2058_v0 }
 0x13c   : > { %v451_v13 = vpop.trf.xlu0 }
 0x13d   : > { %1652 = vmatmul.mubr.msk.f32.gmra.mrb[16].mxu0 %vm500_vm1, %v451_v13 }
 0x13e   : > { %720 = vmatprep.mubr.f32.mxu0 %v2058_v0 }
 0x140   : > { %v452_v14 = vpop.trf.xlu0 }
 0x141   : > { %1653 = vmatmul.mubr.msk.f32.gmra.mrb[18].mxu0 %vm500_vm1, %v452_v14 }
 0x142   : > { %726 = vmatprep.mubr.f32.mxu0 %v2058_v0 }
 0x144   : > { %v453_v15 = vpop.trf.xlu0 }
 0x145   : > { %1654 = vmatmul.mubr.msk.f32.gmra.mrb[20].mxu0 %vm500_vm1, %v453_v15 }
 0x146   : > { %732 = vmatprep.mubr.f32.mxu0 %v2058_v0 }
 0x148   : > { %v454_v16 = vpop.trf.xlu0 }
 0x149   : > { %1655 = vmatmul.mubr.msk.f32.gmra.mrb[22].mxu0 %vm500_vm1, %v454_v16 }
 0x14a   : > { %738 = vmatprep.mubr.f32.mxu0 %v2058_v0 }
 0x14c   : > { %v455_v17 = vpop.trf.xlu0 }
 0x14d   : > { %1656 = vmatmul.mubr.msk.f32.gmra.mrb[24].mxu0 %vm500_vm1, %v455_v17 }
 0x14e   : > { %744 = vmatprep.mubr.f32.mxu0 %v2058_v0 }
 0x150   : > { %v456_v18 = vpop.trf.xlu0 }
 0x151   : > { %1657 = vmatmul.mubr.msk.f32.gmra.mrb[26].mxu0 %vm500_vm1, %v456_v18 }
 0x152   : > { %750 = vmatprep.mubr.f32.mxu0 %v2058_v0 }
 0x154   : > { %v457_v19 = vpop.trf.xlu0 }
 0x155   : > { %1658 = vmatmul.mubr.msk.f32.gmra.mrb[28].mxu0 %vm500_vm1, %v457_v19 }
 0x156   : > { %756 = vmatprep.mubr.f32.mxu0 %v2058_v0 }
 0x158   : > { %v458_v20 = vpop.trf.xlu0 }
 0x159   : > { %1659 = vmatmul.mubr.msk.f32.gmra.mrb[30].mxu0 %vm500_vm1, %v458_v20 }
 0x15a   : > { %762 = vmatprep.mubr.f32.mxu0 %v2058_v0 }
 0x15c   : > { %v475_v21 = vpop.trf.xlu0 }
 0x15d   : > { %1660 = vmatmul.mubr.msk.f32.gmra.mrb[32].mxu0 %vm500_vm1, %v475_v21 }
 0x15e   : > { %768 = vmatprep.mubr.f32.mxu0 %v2058_v0 }
 0x160   : > { %v476_v22 = vpop.trf.xlu0 }
 0x161   : > { %1661 = vmatmul.mubr.msk.f32.gmra.mrb[34].mxu0 %vm500_vm1, %v476_v22 }
 0x162   : > { %774 = vmatprep.mubr.f32.mxu0 %v2058_v0 }
 0x164   : > { %v477_v23 = vpop.trf.xlu0 }
 0x165   : > { %1662 = vmatmul.mubr.msk.f32.gmra.mrb[36].mxu0 %vm500_vm1, %v477_v23 }
 0x166   : > { %780 = vmatprep.mubr.f32.mxu0 %v2058_v0 }
 0x168   : > { %v478_v24 = vpop.trf.xlu0 }
 0x169   : > { %1663 = vmatmul.mubr.msk.f32.gmra.mrb[38].mxu0 %vm500_vm1, %v478_v24 }
 0x16a   : > { %786 = vmatprep.mubr.f32.mxu0 %v2058_v0 }
 0x16c   : > { %v479_v25 = vpop.trf.xlu0 }
 0x16d   : > { %1664 = vmatmul.mubr.msk.f32.gmra.mrb[40].mxu0 %vm500_vm1, %v479_v25 }
 0x16e   : > { %792 = vmatprep.mubr.f32.mxu0 %v2058_v0 }
 0x170   : > { %v480_v26 = vpop.trf.xlu0 }
 0x171   : > { %1665 = vmatmul.mubr.msk.f32.gmra.mrb[42].mxu0 %vm500_vm1, %v480_v26 }
 0x172   : > { %798 = vmatprep.mubr.f32.mxu0 %v2058_v0 }
 0x174   : > { %v481_v27 = vpop.trf.xlu0 }
 0x175   : > { %1666 = vmatmul.mubr.msk.f32.gmra.mrb[44].mxu0 %vm500_vm1, %v481_v27 }
 0x176   : > { %804 = vmatprep.mubr.f32.mxu0 %v2058_v0 }
 0x178   : > { %v482_v28 = vpop.trf.xlu0 }
 0x179   : > { %1667 = vmatmul.mubr.msk.f32.gmra.mrb[46].mxu0 %vm500_vm1, %v482_v28 }
 0x17a   : > { %810 = vmatprep.mubr.f32.mxu0 %v2058_v0 }
 0x17c   : > { %v483_v29 = vpop.trf.xlu0 }
 0x17d   : > { %1668 = vmatmul.mubr.msk.f32.gmra.mrb[48].mxu0 %vm500_vm1, %v483_v29 }
 0x17e   : > { %816 = vmatprep.mubr.f32.mxu0 %v2058_v0 }
 0x180   : > { %v484_v30 = vpop.trf.xlu0 }
 0x181   : > { %1669 = vmatmul.mubr.msk.f32.gmra.mrb[50].mxu0 %vm500_vm1, %v484_v30 }
 0x182   : > { %822 = vmatprep.mubr.f32.mxu0 %v2058_v0 }
 0x184   : > { %v485_v31 = vpop.trf.xlu0 }
 0x185   : > { %1670 = vmatmul.mubr.msk.f32.gmra.mrb[52].mxu0 %vm500_vm1, %v485_v31 }
 0x186   : > { %828 = vmatprep.mubr.f32.mxu0 %v2058_v0 }
 0x188   : > { %v486_v32 = vpop.trf.xlu0 }
 0x189   : > { %1671 = vmatmul.mubr.msk.f32.gmra.mrb[54].mxu0 %vm500_vm1, %v486_v32 }
 0x18a   : > { %834 = vmatprep.mubr.f32.mxu0 %v2058_v0 }
 0x18c   : > { %v487_v33 = vpop.trf.xlu0 }
 0x18d   : > { %1672 = vmatmul.mubr.msk.f32.gmra.mrb[56].mxu0 %vm500_vm1, %v487_v33 }
 0x18e   : > { %840 = vmatprep.mubr.f32.mxu0 %v2058_v0 }
 0x190   : > { %v488_v34 = vpop.trf.xlu0 }
 0x191   : > { %1673 = vmatmul.mubr.msk.f32.gmra.mrb[58].mxu0 %vm500_vm1, %v488_v34 }
 0x192   : > { %846 = vmatprep.mubr.f32.mxu0 %v2058_v0 }
 0x194   : > { %v489_v35 = vpop.trf.xlu0 }
 0x195   : > { %1674 = vmatmul.mubr.msk.f32.gmra.mrb[60].mxu0 %vm500_vm1, %v489_v35 }
 0x196   : > { %852 = vmatprep.mubr.f32.mxu0 %v2058_v0 }
 0x198   : > { %v490_v36 = vpop.trf.xlu0 }
 0x199   : > { %1675 = vmatmul.mubr.msk.f32.gmra.mrb[62].mxu0 %vm500_vm1, %v490_v36 }
 0x1f0   : > { %v2427_v37 = vpop.f32.mrb[0].mxu0 }
 0x1f1   : > { %2998 = vst [vmem:[#allocation22_spill] sm:$0xff] %v2427_v37  ;;  %v2429_v38 = vpop.f32.mrb[1].mxu0 }
 0x1f2   : > { %2999 = vst [vmem:[#allocation23_spill] sm:$0xff] %v2429_v38 }
 0x1f4   : > { %v2431_v39 = vpop.f32.mrb[2].mxu0 }
 0x1f5   : > { %v2433_v40 = vpop.f32.mrb[3].mxu0 }
 0x1f8   : > { %v2435_v41 = vpop.f32.mrb[4].mxu0 }
 0x1f9   : > { %v860_v42 = vmax.f32 %v2427_v37, %v2435_v41  ;;  %v2439_v43 = vpop.f32.mrb[5].mxu0 }
 0x1fa   : > { %v897_v45 = vmax.f32 %v2429_v38, %v2439_v43 }
 0x1fc   : > { %v2448_v47 = vpop.f32.mrb[6].mxu0 }
 0x1fd   : > { %v861_v49 = vmax.f32 %v2431_v39, %v2448_v47  ;;  %v2457_v50 = vpop.f32.mrb[7].mxu0 }
 0x1fe   : > { %v898_v51 = vmax.f32 %v2433_v40, %v2457_v50 }
 0x200   : > { %v2461_v52 = vpop.f32.mrb[8].mxu0 }
 0x201   : > { %v862_v53 = vmax.f32 %v860_v42, %v2461_v52  ;;  %v2464_v54 = vpop.f32.mrb[9].mxu0 }
 0x202   : > { %v899_v55 = vmax.f32 %v897_v45, %v2464_v54 }
 0x204   : > { %v2467_v56 = vpop.f32.mrb[10].mxu0 }
 0x205   : > { %v863_v57 = vmax.f32 %v861_v49, %v2467_v56  ;;  %v2470_v58 = vpop.f32.mrb[11].mxu0 }
 0x206   : > { %v900_v59 = vmax.f32 %v898_v51, %v2470_v58 }
 0x208   : > { %v2473_v60 = vpop.f32.mrb[12].mxu0 }
 0x209   : > { %v864_v61 = vmax.f32 %v862_v53, %v2473_v60  ;;  %v2476_v62 = vpop.f32.mrb[13].mxu0 }
 0x20a   : > { %v901_v63 = vmax.f32 %v899_v55, %v2476_v62 }
 0x20c   : > { %v2479_v0 = vpop.f32.mrb[14].mxu0 }
 0x20d   : > { %v865_v1 = vmax.f32 %v863_v57, %v2479_v0  ;;  %v2482_v2 = vpop.f32.mrb[15].mxu0 }
 0x20e   : > { %v902_v3 = vmax.f32 %v900_v59, %v2482_v2 }
 0x210   : > { %v2485_v4 = vpop.f32.mrb[16].mxu0 }
 0x211   : > { %v866_v5 = vmax.f32 %v864_v61, %v2485_v4  ;;  %v2488_v6 = vpop.f32.mrb[17].mxu0 }
 0x212   : > { %v903_v7 = vmax.f32 %v901_v63, %v2488_v6 }
 0x214   : > { %v2491_v8 = vpop.f32.mrb[18].mxu0 }
 0x215   : > { %v867_v9 = vmax.f32 %v865_v1, %v2491_v8  ;;  %v2494_v10 = vpop.f32.mrb[19].mxu0 }
 0x216   : > { %v904_v11 = vmax.f32 %v902_v3, %v2494_v10 }
 0x218   : > { %v2497_v12 = vpop.f32.mrb[20].mxu0 }
 0x219   : > { %v868_v13 = vmax.f32 %v866_v5, %v2497_v12  ;;  %v2500_v14 = vpop.f32.mrb[21].mxu0 }
 0x21a   : > { %v905_v15 = vmax.f32 %v903_v7, %v2500_v14 }
 0x21c   : > { %v2503_v16 = vpop.f32.mrb[22].mxu0 }
 0x21d   : > { %v869_v17 = vmax.f32 %v867_v9, %v2503_v16  ;;  %v2506_v18 = vpop.f32.mrb[23].mxu0 }
 0x21e   : > { %v906_v19 = vmax.f32 %v904_v11, %v2506_v18 }
 0x220   : > { %v2509_v20 = vpop.f32.mrb[24].mxu0 }
 0x221   : > { %v870_v21 = vmax.f32 %v868_v13, %v2509_v20  ;;  %v2512_v22 = vpop.f32.mrb[25].mxu0 }
 0x222   : > { %v907_v23 = vmax.f32 %v905_v15, %v2512_v22 }
 0x224   : > { %v2515_v24 = vpop.f32.mrb[26].mxu0 }
 0x225   : > { %v871_v25 = vmax.f32 %v869_v17, %v2515_v24  ;;  %v2518_v26 = vpop.f32.mrb[27].mxu0 }
 0x226   : > { %v908_v27 = vmax.f32 %v906_v19, %v2518_v26 }
 0x228   : > { %v2521_v28 = vpop.f32.mrb[28].mxu0 }
 0x229   : > { %v872_v29 = vmax.f32 %v870_v21, %v2521_v28  ;;  %v2524_v30 = vpop.f32.mrb[29].mxu0 }
 0x22a   : > { %v909_v31 = vmax.f32 %v907_v23, %v2524_v30 }
 0x22c   : > { %v2527_v32 = vpop.f32.mrb[30].mxu0 }
 0x22d   : > { %v873_v33 = vmax.f32 %v871_v25, %v2527_v32  ;;  %v2530_v34 = vpop.f32.mrb[31].mxu0 }
 0x22e   : > { %v910_v35 = vmax.f32 %v908_v27, %v2530_v34 }
 0x230   : > { %v2533_v36 = vpop.f32.mrb[32].mxu0 }
 0x231   : > { %v874_v42 = vmax.f32 %v872_v29, %v2533_v36  ;;  %v2536_v45 = vpop.f32.mrb[33].mxu0 }
 0x232   : > { %v911_v48 = vmax.f32 %v909_v31, %v2536_v45 }
 0x234   : > { %v2539_v49 = vpop.f32.mrb[34].mxu0 }
 0x235   : > { %v875_v51 = vmax.f32 %v873_v33, %v2539_v49  ;;  %v2542_v53 = vpop.f32.mrb[35].mxu0 }
 0x236   : > { %v912_v55 = vmax.f32 %v910_v35, %v2542_v53 }
 0x238   : > { %v2545_v57 = vpop.f32.mrb[36].mxu0 }
 0x239   : > { %v876_v59 = vmax.f32 %v874_v42, %v2545_v57  ;;  %v2548_v61 = vpop.f32.mrb[37].mxu0 }
 0x23a   : > { %v913_v63 = vmax.f32 %v911_v48, %v2548_v61 }
 0x23c   : > { %v2551_v1 = vpop.f32.mrb[38].mxu0 }
 0x23d   : > { %v877_v3 = vmax.f32 %v875_v51, %v2551_v1  ;;  %v2554_v5 = vpop.f32.mrb[39].mxu0 }
 0x23e   : > { %v914_v7 = vmax.f32 %v912_v55, %v2554_v5 }
 0x240   : > { %v2557_v9 = vpop.f32.mrb[40].mxu0 }
 0x241   : > { %3003 = vst [vmem:[#allocation25_spill] sm:$0xff] %v2557_v9  ;;  %v878_v11 = vmax.f32 %v876_v59, %v2557_v9  ;;  %v2560_v13 = vpop.f32.mrb[41].mxu0 }
 0x242   : > { %3004 = vst [vmem:[#allocation26_spill] sm:$0xff] %v2560_v13  ;;  %v915_v15 = vmax.f32 %v913_v63, %v2560_v13 }
 0x244   : > { %v2563_v17 = vpop.f32.mrb[42].mxu0 }
 0x245   : > { %3005 = vst [vmem:[#allocation27_spill] sm:$0xff] %v2563_v17  ;;  %v879_v19 = vmax.f32 %v877_v3, %v2563_v17  ;;  %v2566_v21 = vpop.f32.mrb[43].mxu0 }
 0x246   : > { %3006 = vst [vmem:[#allocation28_spill] sm:$0xff] %v2566_v21  ;;  %v916_v23 = vmax.f32 %v914_v7, %v2566_v21 }
 0x248   : > { %v2569_v25 = vpop.f32.mrb[44].mxu0 }
 0x249   : > { %3007 = vst [vmem:[#allocation29_spill] sm:$0xff] %v2569_v25  ;;  %v880_v27 = vmax.f32 %v878_v11, %v2569_v25  ;;  %v2572_v29 = vpop.f32.mrb[45].mxu0  ;;  %v2060_v25 = vmov 1966171168  }
 0x24a   : > { %3008 = vst [vmem:[#allocation30_spill] sm:$0xff] %v2572_v29  ;;  %v917_v31 = vmax.f32 %v915_v15, %v2572_v29 }
 0x24c   : > { %v2575_v33 = vpop.f32.mrb[46].mxu0 }
 0x24d   : > { %3009 = vst [vmem:[#allocation31_spill] sm:$0xff] %v2575_v33  ;;  %v881_v35 = vmax.f32 %v879_v19, %v2575_v33  ;;  %v2578_v42 = vpop.f32.mrb[47].mxu0 }
 0x24e   : > { %3010 = vst [vmem:[#allocation32_spill] sm:$0xff] %v2578_v42  ;;  %v918_v48 = vmax.f32 %v916_v23, %v2578_v42 }
 0x250   : > { %v2581_v51 = vpop.f32.mrb[48].mxu0 }
 0x251   : > { %3011 = vst [vmem:[#allocation33_spill] sm:$0xff] %v2581_v51  ;;  %v882_v55 = vmax.f32 %v880_v27, %v2581_v51  ;;  %v2584_v59 = vpop.f32.mrb[49].mxu0 }
 0x252   : > { %3012 = vst [vmem:[#allocation34_spill] sm:$0xff] %v2584_v59  ;;  %v919_v63 = vmax.f32 %v917_v31, %v2584_v59 }
 0x254   : > { %v2587_v3 = vpop.f32.mrb[50].mxu0 }
 0x255   : > { %3013 = vst [vmem:[#allocation35_spill] sm:$0xff] %v2587_v3  ;;  %v883_v7 = vmax.f32 %v881_v35, %v2587_v3  ;;  %v2590_v11 = vpop.f32.mrb[51].mxu0 }
 0x256   : > { %3014 = vst [vmem:[#allocation36_spill] sm:$0xff] %v2590_v11  ;;  %v920_v15 = vmax.f32 %v918_v48, %v2590_v11 }
 0x258   : > { %v2593_v19 = vpop.f32.mrb[52].mxu0 }
 0x259   : > { %3015 = vst [vmem:[#allocation37_spill] sm:$0xff] %v2593_v19  ;;  %v884_v23 = vmax.f32 %v882_v55, %v2593_v19  ;;  %v2596_v44 = vpop.f32.mrb[53].mxu0 }
 0x25a   : > { %3016 = vst [vmem:[#allocation38_spill] sm:$0xff] %v2596_v44  ;;  %v921_v27 = vmax.f32 %v919_v63, %v2596_v44 }
 0x25c   : > { %v2599_v51 = vpop.f32.mrb[54].mxu0 }
 0x25d   : > { %3017 = vst [vmem:[#allocation39_spill] sm:$0xff] %v2599_v51  ;;  %v885_v31 = vmax.f32 %v883_v7, %v2599_v51  ;;  %v2602_v59 = vpop.f32.mrb[55].mxu0 }
 0x25e   : > { %3018 = vst [vmem:[#allocation40_spill] sm:$0xff] %v2602_v59  ;;  %v922_v35 = vmax.f32 %v920_v15, %v2602_v59 }
 0x260   : > { %v2605_v3 = vpop.f32.mrb[56].mxu0 }
 0x261   : > { %3019 = vst [vmem:[#allocation41_spill] sm:$0xff] %v2605_v3  ;;  %v886_v48 = vmax.f32 %v884_v23, %v2605_v3  ;;  %v2608_v11 = vpop.f32.mrb[57].mxu0 }
 0x262   : > { %3020 = vst [vmem:[#allocation42_spill] sm:$0xff] %v2608_v11  ;;  %v923_v55 = vmax.f32 %v921_v27, %v2608_v11 }
 0x264   : > { %v2611_v19 = vpop.f32.mrb[58].mxu0 }
 0x265   : > { %3021 = vst [vmem:[#allocation43_spill] sm:$0xff] %v2611_v19  ;;  %v887_v63 = vmax.f32 %v885_v31, %v2611_v19  ;;  %v2614_v44 = vpop.f32.mrb[59].mxu0 }
 0x266   : > { %3022 = vst [vmem:[#allocation44_spill] sm:$0xff] %v2614_v44  ;;  %v924_v7 = vmax.f32 %v922_v35, %v2614_v44 }
 0x268   : > { %v2617_v51 = vpop.f32.mrb[60].mxu0 }
 0x269   : > { %3023 = vst [vmem:[#allocation45_spill] sm:$0xff] %v2617_v51  ;;  %v888_v15 = vmax.f32 %v886_v48, %v2617_v51  ;;  %v2620_v59 = vpop.f32.mrb[61].mxu0  ;;  %v938_v48 = vunpack.c.l.s4 %v2060_v25 }
 0x26a   : > { %3024 = vst [vmem:[#allocation46_spill] sm:$0xff] %v2620_v59  ;;  %v925_v23 = vmax.f32 %v923_v55, %v2620_v59 }
 0x26b   : > { %v939_v17 = vunpack.c.0.s8 %v938_v48 }
 0x26c   : > { %v2623_v3 = vpop.f32.mrb[62].mxu0 }
 0x26d   : > { %3025 = vst [vmem:[#allocation47_spill] sm:$0xff] %v2623_v3  ;;  %v889_v27 = vmax.f32 %v887_v63, %v2623_v3  ;;  %v2626_v11 = vpop.f32.mrb[63].mxu0  ;;  %v3027_v63 = vlaneseq }
 0x26e   : > { %3026 = vst [vmem:[#allocation48_spill] sm:$0xff] %v2626_v11  ;;  %v926_v31 = vmax.f32 %v924_v7, %v2626_v11 }
 0x26f   : > { %v890_v19 = vmax.f32 %v888_v15, %v889_v27  ;;  %v941_v3 = vshrl.u32 %v3027_v63, 7 }
 0x270   : > { %v927_v42 = vmax.f32 %v925_v23, %v926_v31 }
 0x271   : > { %v891_v33 = vrot.slane %v890_v19, 4  ;;  %v2630_v23 = vsub.s32 %v939_v17, %v941_v3 }
 0x272   : > { %v928_v35 = vrot.slane %v927_v42, 4 }
 0x273   : > { %v892_v44 = vmax.f32 %v890_v19, %v891_v33  ;;  %3028 = vst [vmem:[#allocation49_spill] sm:$0xff] %v2630_v23  ;;  %v2636_v19 = vsub.s32 0, %v941_v3 }
 0x274   : > { %v929_v29 = vmax.f32 %v927_v42, %v928_v35  ;;  %v2633_v42 = vld [vmem:[#allocation2] sm:$0x3] }
 0x275   : > { %v893_v51 = vrot.slane %v892_v44, 2  ;;  %3029 = vst [vmem:[#allocation50_spill] sm:$0xff] %v2633_v42  ;;  %3030 = vst [vmem:[#allocation51_spill] sm:$0xff] %v2636_v19 }
 0x276   : > { %v930_v21 = vrot.slane %v929_v29, 2 }
 0x277   : > { %v894_v55 = vmax.f32 %v892_v44, %v893_v51  ;;  %v2638_v44 = vsub.s32 1, %v941_v3 }
 0x278   : > { %v931_v59 = vmax.f32 %v929_v29, %v930_v21  ;;  %v412_v21 = vld [vmem:[%s2353_s19 + $0x8] sm:$0xff]  ;;  %v414_v29 = vld [vmem:[%s2353_s19 + $0x18] sm:$0xff] }
 0x279   : > { %v895_v13 = vrot.slane %v894_v55, 1  ;;  %3031 = vst [vmem:[#allocation52_spill] sm:$0xff] %v2638_v44 }
 0x27a   : > { %v932_v9 = vrot.slane %v931_v59, 1 }
 0x27b   : > { %v896_v7 = vmax.f32 %v894_v55, %v895_v13  ;;  %v1343_v13 = vpack.c.bf16 %v414_v29, %v412_v21 }
 0x27c   : > { %v933_v15 = vmax.f32 %v931_v59, %v932_v9 }
 0x27d   : > { %1376 = vmatprep.mubr.bf16.mxu1 %v1343_v13 }
 0x27e   : > { %v936_v27 = vcombine.low %v896_v7, %v933_v15 }
 0x280   : > { %v943_v33 = vrot.slane %v936_v27, %v2630_v23 }
 0x282   : > { %v950_v25 = vrot.slane %v943_v33, %v2630_v23 }
 0x284   : > { %v2643_v51 = vmax.f32 %v2633_v42, %v950_v25 }
 0x286   : > { %3032 = vst [vmem:[#allocation53_spill] sm:$0xff] %v2643_v51  ;;  %v2649_v17 = vrot.slane %v2643_v51, %v2636_v19  ;;  %v2653_v59 = vrot.slane %v2643_v51, %v2638_v44  ;;  %1395 = vst.msk [vmem:[#allocation2] sm:$0x3] %vm2444_vm2, %v2643_v51 }
 0x288   : > { %3033 = vst [vmem:[#allocation54_spill] sm:$0xff] %v2649_v17  ;;  %3034 = vst [vmem:[#allocation55_spill] sm:$0xff] %v2653_v59  ;;  %v969_v35 = vsub.f32 %v2431_v39, %v2649_v17  ;;  %v970_v48 = vsub.f32 %v2433_v40, %v2653_v59  ;;  %v971_v55 = vsub.f32 %v2435_v41, %v2649_v17 }
 0x289   : > { %v972_v63 = vsub.f32 %v2439_v43, %v2653_v59  ;;  %v973_v7 = vsub.f32 %v2448_v47, %v2649_v17  ;;  %v974_v15 = vsub.f32 %v2457_v50, %v2653_v59  ;;  %v975_v27 = vsub.f32 %v2461_v52, %v2649_v17 }
 0x28a   : > { %v976_v39 = vsub.f32 %v2464_v54, %v2653_v59  ;;  %v977_v40 = vsub.f32 %v2467_v56, %v2649_v17  ;;  %v978_v41 = vsub.f32 %v2470_v58, %v2653_v59  ;;  %v979_v43 = vsub.f32 %v2473_v60, %v2649_v17 }
 0x28b   : > { %v980_v47 = vsub.f32 %v2476_v62, %v2653_v59  ;;  %v981_v50 = vsub.f32 %v2479_v0, %v2649_v17  ;;  %v982_v52 = vsub.f32 %v2482_v2, %v2653_v59  ;;  %v983_v54 = vsub.f32 %v2485_v4, %v2649_v17 }
 0x28c   : > { %v984_v56 = vsub.f32 %v2488_v6, %v2653_v59  ;;  %v985_v58 = vsub.f32 %v2491_v8, %v2649_v17  ;;  %v986_v60 = vsub.f32 %v2494_v10, %v2653_v59  ;;  %v987_v62 = vsub.f32 %v2497_v12, %v2649_v17 }
 0x28d   : > { %v988_v0 = vsub.f32 %v2500_v14, %v2653_v59  ;;  %v989_v2 = vsub.f32 %v2503_v16, %v2649_v17  ;;  %v990_v4 = vsub.f32 %v2506_v18, %v2653_v59  ;;  %v991_v6 = vsub.f32 %v2509_v20, %v2649_v17 }
 0x28e   : > { %v992_v8 = vsub.f32 %v2512_v22, %v2653_v59  ;;  %v993_v10 = vsub.f32 %v2515_v24, %v2649_v17  ;;  %v994_v12 = vsub.f32 %v2518_v26, %v2653_v59  ;;  %v995_v14 = vsub.f32 %v2521_v28, %v2649_v17 }
 0x28f   : > { %v996_v16 = vsub.f32 %v2524_v30, %v2653_v59  ;;  %v997_v18 = vsub.f32 %v2527_v32, %v2649_v17  ;;  %v998_v20 = vsub.f32 %v2530_v34, %v2653_v59  ;;  %v999_v22 = vsub.f32 %v2533_v36, %v2649_v17 }
 0x290   : > { %v1000_v24 = vsub.f32 %v2536_v45, %v2653_v59  ;;  %v1001_v26 = vsub.f32 %v2539_v49, %v2649_v17  ;;  %v1002_v28 = vsub.f32 %v2542_v53, %v2653_v59  ;;  %v1003_v30 = vsub.f32 %v2545_v57, %v2649_v17  ;;  %v3035_v45 = vld [vmem:[#allocation25_spill] sm:$0xff]  ;;  %v3036_v49 = vld [vmem:[#allocation26_spill] sm:$0xff]  ;;  %v3037_v53 = vld [vmem:[#allocation27_spill] sm:$0xff] }
 0x291   : > { %v1004_v32 = vsub.f32 %v2548_v61, %v2653_v59  ;;  %v1005_v34 = vsub.f32 %v2551_v1, %v2649_v17  ;;  %v1006_v36 = vsub.f32 %v2554_v5, %v2653_v59  ;;  %v1007_v33 = vsub.f32 %v3035_v45, %v2649_v17  ;;  %v3038_v57 = vld [vmem:[#allocation28_spill] sm:$0xff]  ;;  %v3039_v61 = vld [vmem:[#allocation29_spill] sm:$0xff]  ;;  %v3040_v1 = vld [vmem:[#allocation30_spill] sm:$0xff] }
 0x292   : > { %v1008_v25 = vsub.f32 %v3036_v49, %v2653_v59  ;;  %v1009_v21 = vsub.f32 %v3037_v53, %v2649_v17  ;;  %v1010_v29 = vsub.f32 %v3038_v57, %v2653_v59  ;;  %v1011_v13 = vsub.f32 %v3039_v61, %v2649_v17  ;;  %v3041_v5 = vld [vmem:[#allocation31_spill] sm:$0xff]  ;;  %v3042_v45 = vld [vmem:[#allocation32_spill] sm:$0xff]  ;;  %v3043_v49 = vld [vmem:[#allocation33_spill] sm:$0xff] }
 0x293   : > { %v1012_v9 = vsub.f32 %v3040_v1, %v2653_v59  ;;  %v1013_v31 = vsub.f32 %v3041_v5, %v2649_v17  ;;  %v1014_v3 = vsub.f32 %v3042_v45, %v2653_v59  ;;  %v1015_v44 = vsub.f32 %v3043_v49, %v2649_v17  ;;  %v3044_v53 = vld [vmem:[#allocation34_spill] sm:$0xff]  ;;  %v3045_v57 = vld [vmem:[#allocation35_spill] sm:$0xff]  ;;  %v3046_v61 = vld [vmem:[#allocation36_spill] sm:$0xff] }
 0x294   : > { %v1016_v19 = vsub.f32 %v3044_v53, %v2653_v59  ;;  %v1017_v46 = vsub.f32 %v3045_v57, %v2649_v17  ;;  %v1018_v23 = vsub.f32 %v3046_v61, %v2653_v59  ;;  %v3047_v1 = vld [vmem:[#allocation37_spill] sm:$0xff]  ;;  %v3048_v5 = vld [vmem:[#allocation38_spill] sm:$0xff]  ;;  %v3049_v45 = vld [vmem:[#allocation39_spill] sm:$0xff] }
 0x295   : > { %v1019_v51 = vsub.f32 %v3047_v1, %v2649_v17  ;;  %v1020_v42 = vsub.f32 %v3048_v5, %v2653_v59  ;;  %v1021_v38 = vsub.f32 %v3049_v45, %v2649_v17  ;;  %v3050_v49 = vld [vmem:[#allocation40_spill] sm:$0xff]  ;;  %v3051_v53 = vld [vmem:[#allocation41_spill] sm:$0xff]  ;;  %v3052_v57 = vld [vmem:[#allocation42_spill] sm:$0xff] }
 0x296   : > { %v1022_v37 = vsub.f32 %v3050_v49, %v2653_v59  ;;  %v1023_v11 = vsub.f32 %v3051_v53, %v2649_v17  ;;  %v1024_v61 = vsub.f32 %v3052_v57, %v2653_v59  ;;  %v3053_v1 = vld [vmem:[#allocation43_spill] sm:$0xff]  ;;  %v3054_v45 = vld [vmem:[#allocation44_spill] sm:$0xff]  ;;  %v3055_v53 = vld [vmem:[#allocation45_spill] sm:$0xff] }
 0x297   : > { %v1025_v5 = vsub.f32 %v3053_v1, %v2649_v17  ;;  %v1026_v49 = vsub.f32 %v3054_v45, %v2653_v59  ;;  %v1027_v57 = vsub.f32 %v3055_v53, %v2649_v17  ;;  %v3056_v1 = vld [vmem:[#allocation46_spill] sm:$0xff]  ;;  %v3057_v53 = vld [vmem:[#allocation47_spill] sm:$0xff] }
 0x298   : > { %v1028_v45 = vsub.f32 %v3056_v1, %v2653_v59  ;;  %v1029_v1 = vsub.f32 %v3057_v53, %v2649_v17  ;;  %v3058_v17 = vld [vmem:[#allocation48_spill] sm:$0xff] }
 0x299   : > { %v1030_v53 = vsub.f32 %v3058_v17, %v2653_v59  ;;  %v3059_v17 = vld [vmem:[#allocation22_spill] sm:$0xff] }
 0x29a   : > { %v3060_v59 = vld [vmem:[#allocation54_spill] sm:$0xff] }
 0x29b   : > { %v3061_v17 = vsub.f32 %v3059_v17, %v3060_v59 }
 0x29d   : > { %v1031_v59 = vpack.c.bf16 %v969_v35, %v3061_v17  ;;  %v3062_v17 = vld [vmem:[#allocation23_spill] sm:$0xff] }
 0x29e   : > { %v3063_v35 = vld [vmem:[#allocation55_spill] sm:$0xff] }
 0x29f   : > { %v3064_v17 = vsub.f32 %v3062_v17, %v3063_v35 }
 0x2a1   : > { %v1032_v35 = vpack.c.bf16 %v970_v48, %v3064_v17  ;;  %v1033_v17 = vpack.c.bf16 %v973_v7, %v971_v55  ;;  %v1034_v48 = vpack.c.bf16 %v974_v15, %v972_v63  ;;  %v1035_v7 = vpack.c.bf16 %v977_v40, %v975_v27 }
 0x2a2   : > { %v1036_v55 = vpack.c.bf16 %v978_v41, %v976_v39  ;;  %v1037_v15 = vpack.c.bf16 %v981_v50, %v979_v43  ;;  %v1038_v63 = vpack.c.bf16 %v982_v52, %v980_v47  ;;  %v1039_v27 = vpack.c.bf16 %v985_v58, %v983_v54 }
 0x2a3   : > { %v1040_v40 = vpack.c.bf16 %v986_v60, %v984_v56  ;;  %v1041_v39 = vpack.c.bf16 %v989_v2, %v987_v62  ;;  %v2792_v41 = vpack.c.bf16 %v990_v4, %v988_v0  ;;  %v2794_v43 = vpack.c.bf16 %v993_v10, %v991_v6 }
 0x2a4   : > { %v2796_v50 = vpack.c.bf16 %v994_v12, %v992_v8  ;;  %v2798_v47 = vpack.c.bf16 %v997_v18, %v995_v14  ;;  %v2800_v52 = vpack.c.bf16 %v998_v20, %v996_v16  ;;  %v2802_v54 = vpack.c.bf16 %v1001_v26, %v999_v22 }
 0x2a5   : > { %v2804_v58 = vpack.c.bf16 %v1002_v28, %v1000_v24  ;;  %v2806_v56 = vpack.c.bf16 %v1005_v34, %v1003_v30  ;;  %v2808_v60 = vpack.c.bf16 %v1006_v36, %v1004_v32  ;;  %v2810_v2 = vpack.c.bf16 %v1009_v21, %v1007_v33 }
 0x2a6   : > { %v2812_v62 = vpack.c.bf16 %v1010_v29, %v1008_v25  ;;  %v2814_v0 = vpack.c.bf16 %v1013_v31, %v1011_v13  ;;  %v2816_v4 = vpack.c.bf16 %v1014_v3, %v1012_v9  ;;  %v2818_v6 = vpack.c.bf16 %v1017_v46, %v1015_v44 }
 0x2a7   : > { %v2820_v8 = vpack.c.bf16 %v1018_v23, %v1016_v19  ;;  %v2822_v10 = vpack.c.bf16 %v1021_v38, %v1019_v51  ;;  %v2824_v12 = vpack.c.bf16 %v1022_v37, %v1020_v42  ;;  %v2826_v14 = vpack.c.bf16 %v1025_v5, %v1023_v11 }
 0x2a8   : > { %v2828_v16 = vpack.c.bf16 %v1026_v49, %v1024_v61  ;;  %v2830_v18 = vpack.c.bf16 %v1029_v1, %v1027_v57  ;;  %v2832_v20 = vpack.c.bf16 %v1030_v53, %v1028_v45  ;;  %v1064_v31 = vmul.bf16 1069105081, %v1031_v59 }
 0x2a9   : > { %v1067_v22 = vmul.bf16 1069105081, %v1032_v35  ;;  %v1070_v9 = vmul.bf16 1069105081, %v1033_v17  ;;  %v1073_v3 = vmul.bf16 1069105081, %v1034_v48 }
 0x2aa   : > { %1770 = vpow.bf16 %v1064_v31  ;;  %v1076_v46 = vmul.bf16 1069105081, %v1035_v7  ;;  %v1079_v23 = vmul.bf16 1069105081, %v1036_v55  ;;  %v1082_v37 = vmul.bf16 1069105081, %v1037_v15 }
 0x2ab   : > { %1772 = vpow.bf16 %v1067_v22  ;;  %v1085_v38 = vmul.bf16 1069105081, %v1038_v63  ;;  %v1088_v11 = vmul.bf16 1069105081, %v1039_v27  ;;  %v1091_v42 = vmul.bf16 1069105081, %v1040_v40 }
 0x2ac   : > { %1774 = vpow.bf16 %v1070_v9  ;;  %v1094_v51 = vmul.bf16 1069105081, %v1041_v39  ;;  %v1097_v30 = vmul.bf16 1069105081, %v2792_v41  ;;  %v1100_v5 = vmul.bf16 1069105081, %v2794_v43 }
 0x2ad   : > { %1776 = vpow.bf16 %v1073_v3  ;;  %v1103_v45 = vmul.bf16 1069105081, %v2796_v50  ;;  %v1106_v15 = vmul.bf16 1069105081, %v2798_v47  ;;  %v1109_v40 = vmul.bf16 1069105081, %v2800_v52 }
 0x2ae   : > { %1778 = vpow.bf16 %v1076_v46  ;;  %v1112_v46 = vmul.bf16 1069105081, %v2802_v54 }
 0x2af   : > { %1780 = vpow.bf16 %v1079_v23 }
 0x2b0   : > { %1782 = vpow.bf16 %v1082_v37  ;;  %v1115_v37 = vmul.bf16 1069105081, %v2804_v58 }
 0x2b1   : > { %1784 = vpow.bf16 %v1085_v38 }
 0x2b2   : > { %1786 = vpow.bf16 %v1088_v11 }
 0x2b3   : > { %1788 = vpow.bf16 %v1091_v42 }
 0x2b4   : > { %1790 = vpow.bf16 %v1094_v51 }
 0x2b5   : > { %v1771_v19 = vpop.eup %1770  ;;  %1792 = vpow.bf16 %v1097_v30  ;;  %v1121_v30 = vmul.bf16 1069105081, %v2808_v60 }
 0x2b6   : > { %v1773_v44 = vpop.eup %1772  ;;  %v1161_v24 = vunpack.c.l.bf16 %v1771_v19  ;;  %v1163_v26 = vunpack.c.h.bf16 %v1771_v19  ;;  %1794 = vpow.bf16 %v1100_v5  ;;  %v1127_v5 = vmul.bf16 1069105081, %v2812_v62 }
 0x2b7   : > { %v1775_v28 = vpop.eup %1774  ;;  %v1162_v32 = vunpack.c.l.bf16 %v1773_v44  ;;  %v1164_v34 = vunpack.c.h.bf16 %v1773_v44  ;;  %1344 = vmatprep.subr.bf16.mxu1 %v1773_v44  ;;  %1796 = vpow.bf16 %v1103_v45 }
 0x2b8   : > { %v1777_v36 = vpop.eup %1776  ;;  %v1165_v33 = vunpack.c.l.bf16 %v1775_v28  ;;  %v1225_v25 = vadd.f32 %v1163_v26, %v1161_v24  ;;  %1345 = vmatpush1.bf16.msra.mxu1 %v1771_v19  ;;  %v1167_v49 = vunpack.c.h.bf16 %v1775_v28  ;;  %1798 = vpow.bf16 %v1106_v15 }
 0x2b9   : > { %v1779_v21 = vpop.eup %1778  ;;  %v1166_v29 = vunpack.c.l.bf16 %v1777_v36  ;;  %v1262_v13 = vadd.f32 %v1164_v34, %v1162_v32  ;;  %1346 = vmatprep.subr.bf16.mxu1 %v1777_v36  ;;  %v1168_v1 = vunpack.c.h.bf16 %v1777_v36  ;;  %1800 = vpow.bf16 %v1109_v40 }
 0x2ba   : > { %v1781_v61 = vpop.eup %1780  ;;  %v1226_v57 = vadd.f32 %v1225_v25, %v1165_v33  ;;  %v1169_v59 = vunpack.c.l.bf16 %v1779_v21  ;;  %v1171_v63 = vunpack.c.h.bf16 %v1779_v21  ;;  %1802 = vpow.bf16 %v1112_v46 }
 0x2bb   : > { %v1263_v53 = vadd.f32 %v1262_v13, %v1166_v29  ;;  %v1783_v17 = vpop.eup %1782  ;;  %v1170_v48 = vunpack.c.l.bf16 %v1781_v61  ;;  %v1172_v39 = vunpack.c.h.bf16 %v1781_v61  ;;  %v1118_v26 = vmul.bf16 1069105081, %v2806_v56 }
 0x2bc   : > { %v1227_v35 = vadd.f32 %v1226_v57, %v1167_v49  ;;  %1347 = vmatpush1.bf16.msra.mxu1 %v1775_v28  ;;  %v1785_v55 = vpop.eup %1784  ;;  %v1173_v43 = vunpack.c.l.bf16 %v1783_v17  ;;  %v1175_v23 = vunpack.c.h.bf16 %v1783_v17  ;;  %1804 = vpow.bf16 %v1115_v37 }
 0x2bd   : > { %v1264_v7 = vadd.f32 %v1263_v53, %v1168_v1  ;;  %1348 = vmatprep.subr.bf16.mxu1 %v1781_v61  ;;  %v1787_v31 = vpop.eup %1786  ;;  %v1174_v22 = vunpack.c.l.bf16 %v1785_v55  ;;  %v1176_v38 = vunpack.c.h.bf16 %v1785_v55  ;;  %1806 = vpow.bf16 %v1118_v26 }
 0x2be   : > { %v1228_v27 = vadd.f32 %v1227_v35, %v1169_v59  ;;  %v1789_v3 = vpop.eup %1788  ;;  %v1177_v11 = vunpack.c.l.bf16 %v1787_v31  ;;  %v1179_v28 = vunpack.c.h.bf16 %v1787_v31  ;;  %v1124_v13 = vmul.bf16 1069105081, %v2810_v2 }
 0x2bf   : > { %v1265_v41 = vadd.f32 %v1264_v7, %v1170_v48  ;;  %v1791_v19 = vpop.eup %1790  ;;  %v1178_v44 = vunpack.c.l.bf16 %v1789_v3  ;;  %v1180_v32 = vunpack.c.h.bf16 %v1789_v3  ;;  %1808 = vpow.bf16 %v1121_v30 }
 0x2c0   : > { %v1229_v50 = vadd.f32 %v1228_v27, %v1171_v63  ;;  %1349 = vmatpush1.bf16.msra.mxu1 %v1779_v21  ;;  %v1793_v24 = vpop.eup %1792  ;;  %v1181_v34 = vunpack.c.l.bf16 %v1791_v19  ;;  %v1183_v61 = vunpack.c.h.bf16 %v1791_v19  ;;  %1810 = vpow.bf16 %v1124_v13 }
 0x2c1   : > { %v1266_v9 = vadd.f32 %v1265_v41, %v1172_v39  ;;  %1350 = vmatprep.subr.bf16.mxu1 %v1785_v55  ;;  %v1795_v33 = vpop.eup %1794  ;;  %v1182_v25 = vunpack.c.l.bf16 %v1793_v24  ;;  %v1184_v49 = vunpack.c.h.bf16 %v1793_v24  ;;  %1812 = vpow.bf16 %v1127_v5 }
 0x2c2   : > { %v1230_v47 = vadd.f32 %v1229_v50, %v1173_v43  ;;  %v1797_v29 = vpop.eup %1796  ;;  %v1185_v57 = vunpack.c.l.bf16 %v1795_v33  ;;  %v1187_v48 = vunpack.c.h.bf16 %v1795_v33  ;;  %v1133_v7 = vmul.bf16 1069105081, %v2816_v4 }
 0x2c3   : > { %v1267_v52 = vadd.f32 %v1266_v9, %v1174_v22  ;;  %v1799_v1 = vpop.eup %1798  ;;  %v1186_v53 = vunpack.c.l.bf16 %v1797_v29  ;;  %v1188_v55 = vunpack.c.h.bf16 %v1797_v29  ;;  %v1136_v43 = vmul.bf16 1069105081, %v2818_v6 }
 0x2c4   : > { %v1231_v42 = vadd.f32 %v1230_v47, %v1175_v23  ;;  %1351 = vmatpush1.bf16.msra.mxu1 %v1783_v17  ;;  %v1801_v35 = vpop.eup %1800  ;;  %v1130_v17 = vmul.bf16 1069105081, %v2814_v0  ;;  %v1189_v15 = vunpack.c.l.bf16 %v1799_v1  ;;  %v1191_v50 = vunpack.c.h.bf16 %v1799_v1 }
 0x2c5   : > { %v1268_v51 = vadd.f32 %v1267_v52, %v1176_v38  ;;  %1352 = vmatprep.subr.bf16.mxu1 %v1789_v3  ;;  %v1803_v27 = vpop.eup %1802  ;;  %v1190_v40 = vunpack.c.l.bf16 %v1801_v35  ;;  %v1192_v22 = vunpack.c.h.bf16 %v1801_v35  ;;  %v1142_v38 = vmul.bf16 1069105081, %v2822_v10 }
 0x2c6   : > { %v1232_v54 = vadd.f32 %v1231_v42, %v1177_v11  ;;  %1814 = vpow.bf16 %v1130_v17  ;;  %v1193_v9 = vunpack.c.l.bf16 %v1803_v27  ;;  %v1195_v52 = vunpack.c.h.bf16 %v1803_v27 }
 0x2c7   : > { %v1269_v58 = vadd.f32 %v1268_v51, %v1178_v44  ;;  %v1805_v41 = vpop.eup %1804  ;;  %1816 = vpow.bf16 %v1133_v7  ;;  %v1145_v11 = vmul.bf16 1069105081, %v2824_v12  ;;  %v1154_v13 = vmul.bf16 1069105081, %v2830_v18 }
 0x2c8   : > { %v1233_v36 = vadd.f32 %v1232_v54, %v1179_v28  ;;  %1353 = vmatpush1.bf16.msra.mxu1 %v1787_v31  ;;  %v1139_v31 = vmul.bf16 1069105081, %v2820_v8  ;;  %v1807_v46 = vpop.eup %1806  ;;  %v1194_v23 = vunpack.c.l.bf16 %v1805_v41  ;;  %1818 = vpow.bf16 %v1136_v43 }
 0x2c9   : > { %v1270_v21 = vadd.f32 %v1269_v58, %v1180_v32  ;;  %1354 = vmatprep.subr.bf16.mxu1 %v1793_v24  ;;  %v1196_v42 = vunpack.c.h.bf16 %v1805_v41  ;;  %v1148_v54 = vmul.bf16 1069105081, %v2826_v14  ;;  %v1199_v30 = vunpack.c.h.bf16 %v1807_v46 }
 0x2ca   : > { %v1234_v56 = vadd.f32 %v1233_v36, %v1181_v34  ;;  %v1809_v37 = vpop.eup %1808  ;;  %1820 = vpow.bf16 %v1139_v31  ;;  %v1151_v32 = vmul.bf16 1069105081, %v2828_v16 }
 0x2cb   : > { %v1271_v60 = vadd.f32 %v1270_v21, %v1182_v25  ;;  %v1811_v51 = vpop.eup %1810  ;;  %v1198_v24 = vunpack.c.l.bf16 %v1809_v37  ;;  %1822 = vpow.bf16 %v1142_v38  ;;  %v1200_v58 = vunpack.c.h.bf16 %v1809_v37 }
 0x2cc   : > { %v1235_v45 = vadd.f32 %v1234_v56, %v1183_v61  ;;  %1355 = vmatpush1.bf16.msra.mxu1 %v1791_v19  ;;  %v1197_v19 = vunpack.c.l.bf16 %v1807_v46  ;;  %v1813_v28 = vpop.eup %1812  ;;  %1824 = vpow.bf16 %v1145_v11  ;;  %v1201_v34 = vunpack.c.l.bf16 %v1811_v51 }
 0x2cd   : > { %v1272_v59 = vadd.f32 %v1271_v60, %v1184_v49  ;;  %1356 = vmatprep.subr.bf16.mxu1 %v1797_v29  ;;  %v1202_v25 = vunpack.c.l.bf16 %v1813_v28  ;;  %1826 = vpow.bf16 %v1148_v54  ;;  %v1203_v61 = vunpack.c.h.bf16 %v1811_v51 }
 0x2ce   : > { %v1236_v2 = vadd.f32 %v1235_v45, %v1185_v57  ;;  %1828 = vpow.bf16 %v1151_v32  ;;  %v1157_v56 = vmul.bf16 1069105081, %v2832_v20  ;;  %v1204_v5 = vunpack.c.h.bf16 %v1813_v28 }
 0x2cf   : > { %v1273_v62 = vadd.f32 %v1272_v59, %v1186_v53  ;;  %1830 = vpow.bf16 %v1154_v13 }
 0x2d0   : > { %v1237_v63 = vadd.f32 %v1236_v2, %v1187_v48  ;;  %1357 = vmatpush1.bf16.msra.mxu1 %v1795_v33  ;;  %1832 = vpow.bf16 %v1157_v56 }
 0x2d1   : > { %v1274_v39 = vadd.f32 %v1273_v62, %v1188_v55  ;;  %1358 = vmatprep.subr.bf16.mxu1 %v1801_v35  ;;  %v1815_v33 = vpop.eup %1814 }
 0x2d2   : > { %v1238_v0 = vadd.f32 %v1237_v63, %v1189_v15  ;;  %v1817_v29 = vpop.eup %1816  ;;  %v1205_v49 = vunpack.c.l.bf16 %v1815_v33  ;;  %v1207_v59 = vunpack.c.h.bf16 %v1815_v33 }
 0x2d3   : > { %v1275_v4 = vadd.f32 %v1274_v39, %v1190_v40  ;;  %v1819_v57 = vpop.eup %1818  ;;  %v1206_v45 = vunpack.c.l.bf16 %v1817_v29  ;;  %v1208_v18 = vunpack.c.h.bf16 %v1817_v29 }
 0x2d4   : > { %v1239_v3 = vadd.f32 %v1238_v0, %v1191_v50  ;;  %1359 = vmatpush1.bf16.msra.mxu1 %v1799_v1  ;;  %v1209_v48 = vunpack.c.l.bf16 %v1819_v57  ;;  %v1211_v15 = vunpack.c.h.bf16 %v1819_v57 }
 0x2d5   : > { %v1276_v47 = vadd.f32 %v1275_v4, %v1192_v22  ;;  %1360 = vmatprep.subr.bf16.mxu1 %v1805_v41  ;;  %v1821_v53 = vpop.eup %1820 }
 0x2d6   : > { %v1240_v6 = vadd.f32 %v1239_v3, %v1193_v9  ;;  %v1823_v20 = vpop.eup %1822  ;;  %v1210_v7 = vunpack.c.l.bf16 %v1821_v53 }
 0x2d7   : > { %v1277_v8 = vadd.f32 %v1276_v47, %v1194_v23  ;;  %v1825_v62 = vpop.eup %1824  ;;  %v1213_v39 = vunpack.c.l.bf16 %v1823_v20  ;;  %v1215_v22 = vunpack.c.h.bf16 %v1823_v20 }
 0x2d8   : > { %v1241_v44 = vadd.f32 %v1240_v6, %v1195_v52  ;;  %1361 = vmatpush1.bf16.msra.mxu1 %v1803_v27  ;;  %v1212_v27 = vunpack.c.h.bf16 %v1821_v53  ;;  %v1827_v43 = vpop.eup %1826  ;;  %v1214_v50 = vunpack.c.l.bf16 %v1825_v62  ;;  %v1216_v9 = vunpack.c.h.bf16 %v1825_v62 }
 0x2d9   : > { %v1278_v26 = vadd.f32 %v1277_v8, %v1196_v42  ;;  %1362 = vmatprep.subr.bf16.mxu1 %v1809_v37  ;;  %v1829_v31 = vpop.eup %1828  ;;  %v1219_v6 = vunpack.c.h.bf16 %v1827_v43 }
 0x2da   : > { %v1242_v10 = vadd.f32 %v1241_v44, %v1197_v19  ;;  %v1831_v47 = vpop.eup %1830  ;;  %v1218_v37 = vunpack.c.l.bf16 %v1829_v31  ;;  %v1220_v42 = vunpack.c.h.bf16 %v1829_v31 }
 0x2db   : > { %v1279_v12 = vadd.f32 %v1278_v26, %v1198_v24  ;;  %v1833_v52 = vpop.eup %1832  ;;  %v1221_v19 = vunpack.c.l.bf16 %v1831_v47  ;;  %v413_v24 = vld [vmem:[%s2353_s19 + $0x10] sm:$0xff]  ;;  %v1223_v54 = vunpack.c.h.bf16 %v1831_v47 }
 0x2dc   : > { %v1243_v36 = vadd.f32 %v1242_v10, %v1199_v30  ;;  %1363 = vmatpush1.bf16.msra.mxu1 %v1807_v46  ;;  %v1217_v46 = vunpack.c.l.bf16 %v1827_v43  ;;  %v1222_v26 = vunpack.c.l.bf16 %v1833_v52  ;;  %v1224_v10 = vunpack.c.h.bf16 %v1833_v52 }
 0x2dd   : > { %v1280_v21 = vadd.f32 %v1279_v12, %v1200_v58  ;;  %1364 = vmatprep.subr.bf16.mxu1 %v1813_v28 }
 0x2de   : > { %v1244_v14 = vadd.f32 %v1243_v36, %v1201_v34  ;;  %v3065_v36 = vld [vmem:[#allocation50_spill] sm:$0xff] }
 0x2df   : > { %v1281_v16 = vadd.f32 %v1280_v21, %v1202_v25 }
 0x2e0   : > { %v1245_v60 = vadd.f32 %v1244_v14, %v1203_v61  ;;  %1365 = vmatpush1.bf16.msra.mxu1 %v1811_v51  ;;  %v411_v51 = vld [vmem:[%s2353_s19] sm:$0xff] }
 0x2e1   : > { %v1282_v1 = vadd.f32 %v1281_v16, %v1204_v5  ;;  %1366 = vmatprep.subr.bf16.mxu1 %v1817_v29  ;;  %v1342_v58 = vpack.c.bf16 %v413_v24, %v411_v51 }
 0x2e2   : > { %v1246_v35 = vadd.f32 %v1245_v60, %v1205_v49 }
 0x2e3   : > { %v1283_v17 = vadd.f32 %v1282_v1, %v1206_v45 }
 0x2e4   : > { %v1247_v2 = vadd.f32 %v1246_v35, %v1207_v59  ;;  %1367 = vmatpush1.bf16.msra.mxu1 %v1815_v33  ;;  %v3066_v33 = vld [vmem:[#allocation53_spill] sm:$0xff]  ;;  %v1159_v35 = vld [vmem:[#allocation3] sm:$0x3] }
 0x2e5   : > { %v1284_v55 = vadd.f32 %v1283_v17, %v1208_v18  ;;  %1368 = vmatprep.subr.bf16.mxu1 %v1821_v53  ;;  %v3067_v25 = vsub.f32 %v3065_v36, %v3066_v33  ;;  %v3068_v18 = vld [vmem:[#allocation49_spill] sm:$0xff] }
 0x2e6   : > { %v1248_v63 = vadd.f32 %v1247_v2, %v1209_v48 }
 0x2e7   : > { %v1285_v40 = vadd.f32 %v1284_v55, %v1210_v7  ;;  %v954_v21 = vmul.f32 1.442695, %v3067_v25 }
 0x2e8   : > { %v1249_v41 = vadd.f32 %v1248_v63, %v1211_v15  ;;  %1369 = vmatpush1.bf16.msra.mxu1 %v1819_v57  ;;  %v3071_v63 = vld [vmem:[#allocation52_spill] sm:$0xff] }
 0x2e9   : > { %v1286_v0 = vadd.f32 %v1285_v40, %v1212_v27  ;;  %1370 = vmatprep.subr.bf16.mxu1 %v1825_v62  ;;  %1834 = vpow2.f32 %v954_v21  ;;  %v3070_v62 = vld [vmem:[#allocation51_spill] sm:$0xff] }
 0x2ea   : > { %v1250_v4 = vadd.f32 %v1249_v41, %v1213_v39 }
 0x2eb   : > { %v1287_v3 = vadd.f32 %v1286_v0, %v1214_v50 }
 0x2ec   : > { %v1251_v23 = vadd.f32 %v1250_v4, %v1215_v22  ;;  %1371 = vmatpush1.bf16.msra.mxu1 %v1823_v20  ;;  %v1422_v4 = vstv %s1421_s4 }
 0x2ed   : > { %v1288_v38 = vadd.f32 %v1287_v3, %v1216_v9  ;;  %1372 = vmatprep.subr.bf16.mxu1 %v1829_v31 }
 0x2ee   : > { %v1252_v11 = vadd.f32 %v1251_v23, %v1217_v46 }
 0x2ef   : > { %v1289_v8 = vadd.f32 %v1288_v38, %v1218_v37  ;;  %v1427_v38 = vld [vmem:[%s2357_s11] sm:$0xff] }
 0x2f0   : > { %v1253_v44 = vadd.f32 %v1252_v11, %v1219_v6  ;;  %1373 = vmatpush1.bf16.msra.mxu1 %v1827_v43 }
 0x2f1   : > { %v1290_v28 = vadd.f32 %v1289_v8, %v1220_v42  ;;  %1374 = vmatprep.subr.bf16.mxu1 %v1833_v52  ;;  %v1428_v42 = vld [vmem:[%s2357_s11 + $0x8] sm:$0xff] }
 0x2f2   : > { %v1254_v30 = vadd.f32 %v1253_v44, %v1221_v19  ;;  %v1429_v44 = vld [vmem:[%s2357_s11 + $0x10] sm:$0xff] }
 0x2f3   : > { %v1291_v32 = vadd.f32 %v1290_v28, %v1222_v26  ;;  %v1835_v59 = vpop.eup %1834  ;;  %v1430_v28 = vld [vmem:[%s2357_s11 + $0x18] sm:$0xff] }
 0x2f4   : > { %v1255_v12 = vadd.f32 %v1254_v30, %v1223_v54  ;;  %1375 = vmatpush1.bf16.msra.mxu1 %v1831_v47  ;;  %v1160_v48 = vmul.f32 %v1835_v59, %v1159_v35  ;;  %v1331_v40 = vrot.slane %v1835_v59, %v3070_v62  ;;  %v1335_v39 = vrot.slane %v1835_v59, %v3071_v63 }
 0x2f5   : > { %v1292_v34 = vadd.f32 %v1291_v32, %v1224_v10 }
 0x2f6   : > { %v1256_v29 = vrot.slane %v1255_v12, 4  ;;  %v1338_v41 = vmul.f32 0.0, %v1331_v40  ;;  %v1339_v50 = vmul.f32 0.0, %v1335_v39 }
 0x2f7   : > { %v1293_v13 = vrot.slane %v1292_v34, 4  ;;  %1377 = vmatmul.mubr.bf16.vlgmr.msra.gmra.mrb[0].mxu1 %v1342_v58 }
 0x2f8   : > { %v1257_v61 = vadd.f32 %v1256_v29, %v1255_v12 }
 0x2f9   : > { %v1294_v14 = vadd.f32 %v1293_v13, %v1292_v34 }
 0x2fa   : > { %v1258_v56 = vrot.slane %v1257_v61, 2 }
 0x2fb   : > { %v1295_v5 = vrot.slane %v1294_v14, 2 }
 0x2fc   : > { %v1259_v16 = vadd.f32 %v1258_v56, %v1257_v61 }
 0x2fd   : > { %v1296_v49 = vadd.f32 %v1295_v5, %v1294_v14 }
 0x2fe   : > { %v1260_v60 = vrot.slane %v1259_v16, 1 }
 0x2ff   : > { %v1297_v57 = vrot.slane %v1296_v49, 1 }
 0x300   : > { %v1261_v45 = vadd.f32 %v1260_v60, %v1259_v16 }
 0x301   : > { %v1298_v1 = vadd.f32 %v1297_v57, %v1296_v49 }
 0x303   : > { %v1301_v53 = vcombine.low %v1261_v45, %v1298_v1 }
 0x305   : > { %v1308_v17 = vrot.slane %v1301_v53, %v3068_v18 }
 0x307   : > { %v1315_v2 = vrot.slane %v1308_v17, %v3068_v18 }
 0x309   : > { %v1317_v20 = vadd.f32 %v1315_v2, %v1160_v48 }
 0x30b   : > { %1322 = vst.msk [vmem:[#allocation3] sm:$0x3] %vm2444_vm2, %v1317_v20 }
 0x312   : > { %v1403_v55 = vld [vmem:[#allocation3] sm:$0x3] }
 0x313   : > { %v1408_v15 = vrot.slane %v1403_v55, %v3070_v62  ;;  %v1412_v27 = vrot.slane %v1403_v55, %v3071_v63 }
 0x315   : > { %1836 = vrcp.f32 %v1408_v15 }
 0x316   : > { %1838 = vrcp.f32 %v1412_v27 }
 0x31f   : > { %v1837_v22 = vpop.eup %1836 }
 0x320   : > { %v1839_v46 = vpop.eup %1838 }
 0x3ca   : > { %v1378_v43 = vpop.f32.mrb[0].mxu1 }
 0x3cb   : > { %v1387_v0 = vadd.f32 %v1378_v43, %v1338_v41  ;;  %v1380_v31 = vpop.f32.mrb[1].mxu1 }
 0x3cc   : > { %v1388_v9 = vadd.f32 %v1380_v31, %v1339_v50  ;;  %v1382_v3 = vpop.f32.mrb[2].mxu1 }
 0x3cd   : > { %v1416_v23 = vmul.f32 %v1837_v22, %v1387_v0  ;;  %v1389_v47 = vadd.f32 %v1382_v3, %v1338_v41  ;;  %v1384_v37 = vpop.f32.mrb[3].mxu1 }
 0x3ce   : > { %v1418_v52 = vmul.f32 %v1839_v46, %v1388_v9  ;;  %v1390_v6 = vadd.f32 %v1384_v37, %v1339_v50 }
 0x3cf   : > { %v1423_v11 = vmul.f32 %v1422_v4, %v1416_v23  ;;  %v1419_v8 = vmul.f32 %v1837_v22, %v1389_v47 }
 0x3d0   : > { %v1424_v19 = vmul.f32 %v1422_v4, %v1418_v52  ;;  %v1420_v51 = vmul.f32 %v1839_v46, %v1390_v6 }
 0x3d1   : > { %v1431_v24 = vadd.f32 %v1427_v38, %v1423_v11  ;;  %v1425_v26 = vmul.f32 %v1422_v4, %v1419_v8 }
 0x3d2   : > { %v1432_v54 = vadd.f32 %v1428_v42, %v1424_v19  ;;  %v1426_v30 = vmul.f32 %v1422_v4, %v1420_v51 }
 0x3d3   : > { %1435 = vst [vmem:[%s385_s6] sm:$0xff] %v1431_v24  ;;  %v1433_v10 = vadd.f32 %v1429_v44, %v1425_v26 }
 0x3d4   : > { %1436 = vst [vmem:[%s385_s6 + $0x8] sm:$0xff] %v1432_v54  ;;  %v1434_v32 = vadd.f32 %v1430_v28, %v1426_v30 }
 0x3d5   : > { %1437 = vst [vmem:[%s385_s6 + $0x10] sm:$0xff] %v1433_v10 }
 0x3d6   : > { %1438 = vst [vmem:[%s385_s6 + $0x18] sm:$0xff] %v1434_v32 }
 0x3d7   : > { %1973 = shalt.err (!%p1970_p5)
}
 0x3d8   : > { %s1974_s13 = scalar_lea.hbm %s2879_s30, 512  ;;  %s1978_s26 = scalar_lea.hbm %s2933_s5, 1024 }
 0x3d9   : > { %p1975_p1 = scmp.ne.s32.totalorder %s2879_s30, %s1974_s13  ;;  %p1979_p8 = scmp.lt.u32.totalorder %s2879_s30, %s2933_s5 }
 0x3da   : > { %p1980_p2 = scmp.lt.u32.totalorder %s1978_s26, %s1974_s13  ;;  %p1982_p0 = scmp.lt.u32.totalorder %s1974_s13, %s2879_s30 }
 0x3db   : > { %p1976_p6 = pnand %p1975_p1, %p3072_p9 }
 0x3dc   : > { %p1981_p12 = por %p1980_p2, %p1979_p8 }
 0x3dd   : > { %p1977_p4 = pneg %p1976_p6 }
 0x3de   : > { %p1983_p10 = por %p1982_p0, %p1981_p12 }
 0x3e0   : > { %p1984_p13 = pnand %p1983_p10, %p1977_p4 }
 0x3e2   : > { %1987 = shalt.err (!%p1984_p13)
}
 0x3e3   : > { %s2062_s28 = smov 256   ;;  %s2063_s11 = smov 16  }
 0x3e4   : > { %1694 = dma.vmem_to_hbm [thread:$0]  (%p3072_p9), %s2874_s14, 512, %s2879_s30, %s1440_s23, %s2062_s28, %s2062_s28, %s2063_s11  }
 0x3e5 PF: > { %s1470_s4 = sand.u32 1, %s2030_s20   ;;  %p3073_p7 = scmp.ne.s32.totalorder %s2985_s9, 0 }
 0x3e6   : > { %p3074_p11 = scmp.ge.s32.totalorder %s2050_s25, 2  ;;  %s1471_s6 = scalar_lea.sflag [#allocation8], %s1470_s4 }
 0x3e8   : > { %p1710_p3 = pnand %p3074_p11, %p3073_p7 }
 0x3ea   : > { %2025 = dma.done.wait (!%p1710_p3), %s1471_s6, 512  }
 0x3eb   : > { %2027 = vsyncadd (!%p1710_p3), %s1471_s6, 4294966784  ;;  %s28_s25 = sadd.s32 1, %s2050_s25   ;;  %s3075_s12 = sld [smem:[#allocation19_spill]] }
 0x3ec   : > { %p25_p5 = scmp.ge.s32.totalorder %s28_s25, 4   ;;  %s3076_s22 = sld [smem:[#allocation21_spill]] }
 0x3ed   : > { %s3077_s7 = sld [smem:[#allocation20_spill]]  ;;  %s3078_s20 = smov %s2034_s21 }
 0x3ee   : > { %s3080_s23 = smov %s2046_s24  ;;  %27 = sbr.rel (!%p25_p5) target bundleno = 13 (0xd), region = 132 }
 0x3f1   : > { %s3079_s21 = smov %s3075_s12 }
 0x3f3   : > { %s3081_s24 = smov %s3077_s7 }
 0x3f5   :  { %1476 = vsyncpa [#allocation7], 1 }
 0x3f6   :  { %1478 = vsyncpa [#allocation7 + $0x1], 1 }
 0x3f7   :  { %1479 = vsyncpa [#allocation10], 1 }
 0x3f8   :  { %1481 = vsyncpa [#allocation10 + $0x1], 1 }
 0x3f9   :  { %1482 = vsyncpa [#allocation13], 1 }
 0x3fa   :  { %1484 = vsyncpa [#allocation13 + $0x1], 1 }
 0x3fb   :  { %1485 = vsyncpa [#allocation8], 1 }
 0x3fc   :  { %1487 = vsyncpa [#allocation8 + $0x1], 1 }

</bundles_post_ra>
